<compile_context>
chip_gen: v5e
topology: v5e:2x2
jax: 0.10.0
libtpu: 0.0.40
codegen_flags: <defaults>
</compile_context>

<pallas_src>
import math

import jax
import jax.numpy as jnp
from jax.experimental import pallas as pl
from jax.experimental.pallas import tpu as pltpu

# MLP dimensions from LossRateNet.__init__
DIMS = [13, 100, 100, 80, 60, 40, 20, 1]
N_LAYERS = len(DIMS) - 1

PAD = 128        # padded feature width for hidden layers (lane-aligned)
X_PAD = 16       # padded input feature width (13 -> 16, bf16 sublane-friendly)
MAX_TILE = 1024  # batch tile upper bound (sweep 1024-2048 if desired)
MIN_TILE = 256   # batch tile lower bound (multiple of 256 for v6e/v7x MXU)


def _cdiv(a, b):
    return (a + b - 1) // b


def _select_tile(batch):
    """Pick a batch tile: multiple of 256, <= MAX_TILE, and (for large batches)
    small enough that the grid has >= 2 steps so v7x's 2 TensorCores both work."""
    if batch <= MIN_TILE:
        return MIN_TILE
    half = _cdiv(batch, 2)
    tile = _cdiv(half, MIN_TILE) * MIN_TILE
    return int(min(tile, MAX_TILE))


def _mlp_kernel(x_ref, w0_ref, w_ref, b_ref, out_ref):
    """x_ref:  (batch_tile, 16)   bf16
       w0_ref: (16, 128)          bf16   (fc1, zero-padded)
       w_ref:  (6, 128, 128)      bf16   (fc2..fc7, zero-padded)
       b_ref:  (7, 1, 128)        f32    (all biases, zero-padded)
       out_ref:(batch_tile, 128)  f32    (lane-dense; real output is column 0)."""
    # Layer 0 (fc1): bf16 x bf16 -> f32 accumulate, bias + ReLU in f32.
    h = jnp.dot(x_ref[...], w0_ref[...], preferred_element_type=jnp.float32)
    h = jnp.maximum(h + b_ref[0], 0.0)
    # Layers 1..6 (fc2..fc7), statically unrolled.
    for layer in range(1, N_LAYERS):
        w = w_ref[layer - 1]                              # (128, 128) bf16
        h = jnp.dot(h.astype(jnp.bfloat16), w,
                    preferred_element_type=jnp.float32)
        h = h + b_ref[layer]                              # (1, 128) f32 broadcast
        if layer < N_LAYERS - 1:                          # fc7 has no ReLU
            h = jnp.maximum(h, 0.0)
    # Lane-dense store of the full 128-wide slab; wrapper slices column 0.
    out_ref[...] = h


def _pack_params(params):
    """Zero-pad weights/biases.  fc1 -> (16, 128) bf16; fc2..fc7 stacked into
    (6, 128, 128) bf16; biases stacked into (7, 1, 128) f32.  Zero padding keeps
    results exact: padded activation columns are 0 and padded weight rows are 0."""
    w0 = jnp.pad(params[0], ((0, X_PAD - DIMS[0]), (0, PAD - DIMS[1])))
    w0 = w0.astype(jnp.bfloat16)
    w_rest, b_stack = [], []
    for layer in range(N_LAYERS):
        b = params[2 * layer + 1]
        fan_out = DIMS[layer + 1]
        b_stack.append(jnp.pad(b.reshape(1, fan_out), ((0, 0), (0, PAD - fan_out))))
        if layer >= 1:
            w = params[2 * layer]
            fan_in = DIMS[layer]
            wp = jnp.pad(w, ((0, PAD - fan_in), (0, PAD - fan_out)))
            w_rest.append(wp.astype(jnp.bfloat16))
    return (w0,
            jnp.stack(w_rest, axis=0),
            jnp.stack(b_stack, axis=0).astype(jnp.float32))


def loss_rate_net_forward(x, params, *, batch_tile=None):
    """x: (batch, 13) float32.  params: flat list [w1, b1, ..., w7, b7] with
    w_i of shape (in_i, out_i) and b_i of shape (out_i,).  Returns (batch, 1) f32."""
    batch, in_dim = x.shape
    assert in_dim == DIMS[0]

    w0, w_rest, b_packed = _pack_params(params)

    if batch_tile is None:
        batch_tile = _select_tile(batch)
    padded_batch = _cdiv(batch, batch_tile) * batch_tile

    # Pad batch rows and the 13 features -> 16; stream activations as bf16.
    xb = jnp.pad(x, ((0, padded_batch - batch), (0, X_PAD - in_dim)))
    xb = xb.astype(jnp.bfloat16)

    grid = (padded_batch // batch_tile,)

    x_spec = pl.BlockSpec((batch_tile, X_PAD), lambda i: (i, 0))
    # Weights / biases: full-array, grid-invariant blocks (kept resident, no re-DMA).
    w0_spec = pl.BlockSpec((X_PAD, PAD), lambda i: (0, 0))
    w_spec = pl.BlockSpec((N_LAYERS - 1, PAD, PAD), lambda i: (0, 0, 0))
    b_spec = pl.BlockSpec((N_LAYERS, 1, PAD), lambda i: (0, 0, 0))
    # Lane-dense output block (128 wide).
    out_spec = pl.BlockSpec((batch_tile, PAD), lambda i: (i, 0))

    flops = 2 * padded_batch * (X_PAD * PAD + (N_LAYERS - 1) * PAD * PAD)
    bytes_accessed = (xb.size * 2 + w0.size * 2 + w_rest.size * 2
                      + b_packed.size * 4 + padded_batch * PAD * 4)
    cost = pl.CostEstimate(flops=flops, transcendentals=0,
                           bytes_accessed=bytes_accessed)

    out = pl.pallas_call(
        _mlp_kernel,
        out_shape=jax.ShapeDtypeStruct((padded_batch, PAD), jnp.float32),
        grid_spec=pltpu.PrefetchScalarGridSpec(
            num_scalar_prefetch=0,
            grid=grid,
            in_specs=[x_spec, w0_spec, w_spec, b_spec],
            out_specs=out_spec,
        ),
        compiler_params=pltpu.CompilerParams(
            dimension_semantics=("parallel",)
        ),
        cost_estimate=cost,
    )(xb, w0, w_rest, b_packed)

    # Only column 0 of the lane-dense slab is real; padded rows are dropped too.
    return out[:batch, :DIMS[-1]]


def init_params(key):
    """Deterministic init mimicking PyTorch nn.Linear default:
    U(-1/sqrt(fan_in), 1/sqrt(fan_in)) for both weight and bias.
    Weights are returned already transposed to (in, out)."""
    params = []
    for layer in range(N_LAYERS):
        fan_in, fan_out = DIMS[layer], DIMS[layer + 1]
        bound = 1.0 / math.sqrt(fan_in)
        key, kw, kb = jax.random.split(key, 3)
        w = jax.random.uniform(
            kw, (fan_in, fan_out), jnp.float32, minval=-bound, maxval=bound
        )
        b = jax.random.uniform(
            kb, (fan_out,), jnp.float32, minval=-bound, maxval=bound
        )
        params += [w, b]
    return params


def reference_forward(x, params):
    """Plain-JAX f32 reference (PyTorch semantics)."""
    h = x
    for layer in range(N_LAYERS):
        w, b = params[2 * layer], params[2 * layer + 1]
        h = h @ w + b
        if layer < N_LAYERS - 1:
            h = jnp.maximum(h, 0.0)
    return h


def reference_forward_bf16(x, params):
    """Reference with the same bf16-operand / f32-accumulate quantization as the
    kernel (for tight numerical comparison)."""
    h = x
    for layer in range(N_LAYERS):
        w, b = params[2 * layer], params[2 * layer + 1]
        h = jnp.dot(h.astype(jnp.bfloat16), w.astype(jnp.bfloat16),
                    preferred_element_type=jnp.float32) + b
        if layer < N_LAYERS - 1:
            h = jnp.maximum(h, 0.0)
    return h


if __name__ == "__main__":
    key = jax.random.PRNGKey(0)
    key, kx = jax.random.split(key)

    batch = 8  # small synthetic batch (padded internally to one 256-row tile)
    x = jax.random.normal(kx, (batch, DIMS[0]), jnp.float32)
    params = init_params(key)

    out = jax.block_until_ready(loss_rate_net_forward(x, params))
    assert out.shape == (batch, 1)

    # Tight check vs. a reference with identical bf16-operand quantization.
    ref_bf16 = reference_forward_bf16(x, params)
    assert jnp.allclose(out, ref_bf16, atol=1e-3, rtol=1e-3), \
        "mismatch vs bf16-matched reference"

    # Loose sanity check vs. the pure f32 (PyTorch-semantics) reference.
    ref_f32 = reference_forward(x, params)
    assert jnp.allclose(out, ref_f32, atol=5e-2, rtol=5e-2), \
        "mismatch vs f32 reference"

    print("KERNEL_OK")
</pallas_src>

<mosaic_0001>
module attributes {stable_mosaic.version = 11 : i64} {
  func.func @_mlp_kernel(%arg0: i32, %arg1: memref<256x16xbf16, #tpu.memory_space<vmem>>, %arg2: memref<16x128xbf16, #tpu.memory_space<vmem>>, %arg3: memref<6x128x128xbf16, #tpu.memory_space<vmem>>, %arg4: memref<7x1x128xf32, #tpu.memory_space<vmem>>, %arg5: memref<256x128xf32, #tpu.memory_space<vmem>>) attributes {dimension_semantics = [#tpu.dimension_semantics<parallel>], iteration_bounds = array<i64: 1>, scalar_prefetch = 0 : i64, scratch_operands = 0 : i64, tpu.core_type = #tpu.core_type<tc>, window_params = [{transform_indices = @transform_0, window_bounds = array<i64: 256, 16>}, {pipeline_mode = #tpu.pipeline_mode<synchronous>, transform_indices = @transform_1, window_bounds = array<i64: 16, 128>}, {pipeline_mode = #tpu.pipeline_mode<synchronous>, transform_indices = @transform_2, window_bounds = array<i64: 6, 128, 128>}, {pipeline_mode = #tpu.pipeline_mode<synchronous>, transform_indices = @transform_3, window_bounds = array<i64: 7, 1, 128>}, {transform_indices = @transform_4, window_bounds = array<i64: 256, 128>}]} {
    %c0 = arith.constant 0 : index
    %c0_0 = arith.constant 0 : index
    %0 = vector.load %arg1[%c0, %c0_0] : memref<256x16xbf16, #tpu.memory_space<vmem>>, vector<256x16xbf16>
    %c0_1 = arith.constant 0 : index
    %c0_2 = arith.constant 0 : index
    %1 = vector.load %arg2[%c0_1, %c0_2] : memref<16x128xbf16, #tpu.memory_space<vmem>>, vector<16x128xbf16>
    %cst = arith.constant dense<0.000000e+00> : vector<256x128xf32>
    %2 = tpu.matmul %0, %1, %cst {dimension_numbers = #tpu.dot_dimension_numbers<[1], [0], [0], [1], [0, 0, 1, 1], [], []>} : vector<256x16xbf16>, vector<16x128xbf16>, vector<256x128xf32> -> vector<256x128xf32>
    %c0_3 = arith.constant 0 : index
    %c0_4 = arith.constant 0 : index
    %c0_5 = arith.constant 0 : index
    %3 = vector.load %arg4[%c0_3, %c0_4, %c0_5] : memref<7x1x128xf32, #tpu.memory_space<vmem>>, vector<1x1x128xf32>
    %4 = vector.shape_cast %3 : vector<1x1x128xf32> to vector<1x128xf32>
    %5 = vector.broadcast %4 : vector<1x128xf32> to vector<256x128xf32>
    %6 = arith.addf %2, %5 : vector<256x128xf32>
    %cst_6 = arith.constant 0.000000e+00 : f32
    %7 = vector.broadcast %cst_6 : f32 to vector<256x128xf32>
    %8 = arith.maximumf %6, %7 : vector<256x128xf32>
    %c0_7 = arith.constant 0 : index
    %c0_8 = arith.constant 0 : index
    %c0_9 = arith.constant 0 : index
    %9 = vector.load %arg3[%c0_7, %c0_8, %c0_9] : memref<6x128x128xbf16, #tpu.memory_space<vmem>>, vector<1x128x128xbf16>
    %10 = vector.shape_cast %9 : vector<1x128x128xbf16> to vector<128x128xbf16>
    %11 = arith.truncf %8 : vector<256x128xf32> to vector<256x128xbf16>
    %cst_10 = arith.constant dense<0.000000e+00> : vector<256x128xf32>
    %12 = tpu.matmul %11, %10, %cst_10 {dimension_numbers = #tpu.dot_dimension_numbers<[1], [0], [0], [1], [0, 0, 1, 1], [], []>} : vector<256x128xbf16>, vector<128x128xbf16>, vector<256x128xf32> -> vector<256x128xf32>
    %c1 = arith.constant 1 : index
    %c0_11 = arith.constant 0 : index
    %c0_12 = arith.constant 0 : index
    %13 = vector.load %arg4[%c1, %c0_11, %c0_12] : memref<7x1x128xf32, #tpu.memory_space<vmem>>, vector<1x1x128xf32>
    %14 = vector.shape_cast %13 : vector<1x1x128xf32> to vector<1x128xf32>
    %15 = vector.broadcast %14 : vector<1x128xf32> to vector<256x128xf32>
    %16 = arith.addf %12, %15 : vector<256x128xf32>
    %cst_13 = arith.constant 0.000000e+00 : f32
    %17 = vector.broadcast %cst_13 : f32 to vector<256x128xf32>
    %18 = arith.maximumf %16, %17 : vector<256x128xf32>
    %c1_14 = arith.constant 1 : index
    %c0_15 = arith.constant 0 : index
    %c0_16 = arith.constant 0 : index
    %19 = vector.load %arg3[%c1_14, %c0_15, %c0_16] : memref<6x128x128xbf16, #tpu.memory_space<vmem>>, vector<1x128x128xbf16>
    %20 = vector.shape_cast %19 : vector<1x128x128xbf16> to vector<128x128xbf16>
    %21 = arith.truncf %18 : vector<256x128xf32> to vector<256x128xbf16>
    %cst_17 = arith.constant dense<0.000000e+00> : vector<256x128xf32>
    %22 = tpu.matmul %21, %20, %cst_17 {dimension_numbers = #tpu.dot_dimension_numbers<[1], [0], [0], [1], [0, 0, 1, 1], [], []>} : vector<256x128xbf16>, vector<128x128xbf16>, vector<256x128xf32> -> vector<256x128xf32>
    %c2 = arith.constant 2 : index
    %c0_18 = arith.constant 0 : index
    %c0_19 = arith.constant 0 : index
    %23 = vector.load %arg4[%c2, %c0_18, %c0_19] : memref<7x1x128xf32, #tpu.memory_space<vmem>>, vector<1x1x128xf32>
    %24 = vector.shape_cast %23 : vector<1x1x128xf32> to vector<1x128xf32>
    %25 = vector.broadcast %24 : vector<1x128xf32> to vector<256x128xf32>
    %26 = arith.addf %22, %25 : vector<256x128xf32>
    %cst_20 = arith.constant 0.000000e+00 : f32
    %27 = vector.broadcast %cst_20 : f32 to vector<256x128xf32>
    %28 = arith.maximumf %26, %27 : vector<256x128xf32>
    %c2_21 = arith.constant 2 : index
    %c0_22 = arith.constant 0 : index
    %c0_23 = arith.constant 0 : index
    %29 = vector.load %arg3[%c2_21, %c0_22, %c0_23] : memref<6x128x128xbf16, #tpu.memory_space<vmem>>, vector<1x128x128xbf16>
    %30 = vector.shape_cast %29 : vector<1x128x128xbf16> to vector<128x128xbf16>
    %31 = arith.truncf %28 : vector<256x128xf32> to vector<256x128xbf16>
    %cst_24 = arith.constant dense<0.000000e+00> : vector<256x128xf32>
    %32 = tpu.matmul %31, %30, %cst_24 {dimension_numbers = #tpu.dot_dimension_numbers<[1], [0], [0], [1], [0, 0, 1, 1], [], []>} : vector<256x128xbf16>, vector<128x128xbf16>, vector<256x128xf32> -> vector<256x128xf32>
    %c3 = arith.constant 3 : index
    %c0_25 = arith.constant 0 : index
    %c0_26 = arith.constant 0 : index
    %33 = vector.load %arg4[%c3, %c0_25, %c0_26] : memref<7x1x128xf32, #tpu.memory_space<vmem>>, vector<1x1x128xf32>
    %34 = vector.shape_cast %33 : vector<1x1x128xf32> to vector<1x128xf32>
    %35 = vector.broadcast %34 : vector<1x128xf32> to vector<256x128xf32>
    %36 = arith.addf %32, %35 : vector<256x128xf32>
    %cst_27 = arith.constant 0.000000e+00 : f32
    %37 = vector.broadcast %cst_27 : f32 to vector<256x128xf32>
    %38 = arith.maximumf %36, %37 : vector<256x128xf32>
    %c3_28 = arith.constant 3 : index
    %c0_29 = arith.constant 0 : index
    %c0_30 = arith.constant 0 : index
    %39 = vector.load %arg3[%c3_28, %c0_29, %c0_30] : memref<6x128x128xbf16, #tpu.memory_space<vmem>>, vector<1x128x128xbf16>
    %40 = vector.shape_cast %39 : vector<1x128x128xbf16> to vector<128x128xbf16>
    %41 = arith.truncf %38 : vector<256x128xf32> to vector<256x128xbf16>
    %cst_31 = arith.constant dense<0.000000e+00> : vector<256x128xf32>
    %42 = tpu.matmul %41, %40, %cst_31 {dimension_numbers = #tpu.dot_dimension_numbers<[1], [0], [0], [1], [0, 0, 1, 1], [], []>} : vector<256x128xbf16>, vector<128x128xbf16>, vector<256x128xf32> -> vector<256x128xf32>
    %c4 = arith.constant 4 : index
    %c0_32 = arith.constant 0 : index
    %c0_33 = arith.constant 0 : index
    %43 = vector.load %arg4[%c4, %c0_32, %c0_33] : memref<7x1x128xf32, #tpu.memory_space<vmem>>, vector<1x1x128xf32>
    %44 = vector.shape_cast %43 : vector<1x1x128xf32> to vector<1x128xf32>
    %45 = vector.broadcast %44 : vector<1x128xf32> to vector<256x128xf32>
    %46 = arith.addf %42, %45 : vector<256x128xf32>
    %cst_34 = arith.constant 0.000000e+00 : f32
    %47 = vector.broadcast %cst_34 : f32 to vector<256x128xf32>
    %48 = arith.maximumf %46, %47 : vector<256x128xf32>
    %c4_35 = arith.constant 4 : index
    %c0_36 = arith.constant 0 : index
    %c0_37 = arith.constant 0 : index
    %49 = vector.load %arg3[%c4_35, %c0_36, %c0_37] : memref<6x128x128xbf16, #tpu.memory_space<vmem>>, vector<1x128x128xbf16>
    %50 = vector.shape_cast %49 : vector<1x128x128xbf16> to vector<128x128xbf16>
    %51 = arith.truncf %48 : vector<256x128xf32> to vector<256x128xbf16>
    %cst_38 = arith.constant dense<0.000000e+00> : vector<256x128xf32>
    %52 = tpu.matmul %51, %50, %cst_38 {dimension_numbers = #tpu.dot_dimension_numbers<[1], [0], [0], [1], [0, 0, 1, 1], [], []>} : vector<256x128xbf16>, vector<128x128xbf16>, vector<256x128xf32> -> vector<256x128xf32>
    %c5 = arith.constant 5 : index
    %c0_39 = arith.constant 0 : index
    %c0_40 = arith.constant 0 : index
    %53 = vector.load %arg4[%c5, %c0_39, %c0_40] : memref<7x1x128xf32, #tpu.memory_space<vmem>>, vector<1x1x128xf32>
    %54 = vector.shape_cast %53 : vector<1x1x128xf32> to vector<1x128xf32>
    %55 = vector.broadcast %54 : vector<1x128xf32> to vector<256x128xf32>
    %56 = arith.addf %52, %55 : vector<256x128xf32>
    %cst_41 = arith.constant 0.000000e+00 : f32
    %57 = vector.broadcast %cst_41 : f32 to vector<256x128xf32>
    %58 = arith.maximumf %56, %57 : vector<256x128xf32>
    %c5_42 = arith.constant 5 : index
    %c0_43 = arith.constant 0 : index
    %c0_44 = arith.constant 0 : index
    %59 = vector.load %arg3[%c5_42, %c0_43, %c0_44] : memref<6x128x128xbf16, #tpu.memory_space<vmem>>, vector<1x128x128xbf16>
    %60 = vector.shape_cast %59 : vector<1x128x128xbf16> to vector<128x128xbf16>
    %61 = arith.truncf %58 : vector<256x128xf32> to vector<256x128xbf16>
    %cst_45 = arith.constant dense<0.000000e+00> : vector<256x128xf32>
    %62 = tpu.matmul %61, %60, %cst_45 {dimension_numbers = #tpu.dot_dimension_numbers<[1], [0], [0], [1], [0, 0, 1, 1], [], []>} : vector<256x128xbf16>, vector<128x128xbf16>, vector<256x128xf32> -> vector<256x128xf32>
    %c6 = arith.constant 6 : index
    %c0_46 = arith.constant 0 : index
    %c0_47 = arith.constant 0 : index
    %63 = vector.load %arg4[%c6, %c0_46, %c0_47] : memref<7x1x128xf32, #tpu.memory_space<vmem>>, vector<1x1x128xf32>
    %64 = vector.shape_cast %63 : vector<1x1x128xf32> to vector<1x128xf32>
    %65 = vector.broadcast %64 : vector<1x128xf32> to vector<256x128xf32>
    %66 = arith.addf %62, %65 : vector<256x128xf32>
    %c0_48 = arith.constant 0 : index
    %c0_49 = arith.constant 0 : index
    %67 = vector.load %arg5[%c0_48, %c0_49] : memref<256x128xf32, #tpu.memory_space<vmem>>, vector<256x128xf32>
    tpu.vector_store %arg5[%c0_48, %c0_49], %66 {strides = array<i32>} : memref<256x128xf32, #tpu.memory_space<vmem>>, vector<256x128xf32>,
    return
  }
  func.func @transform_0(%arg0: i32) -> (i32, i32) {
    %c0_i32 = arith.constant 0 : i32
    %c0_i32_0 = arith.constant 0 : i32
    return %arg0, %c0_i32 : i32, i32
  }
  func.func @transform_1(%arg0: i32) -> (i32, i32) {
    %c0_i32 = arith.constant 0 : i32
    %c0_i32_0 = arith.constant 0 : i32
    %c0_i32_1 = arith.constant 0 : i32
    return %c0_i32, %c0_i32_0 : i32, i32
  }
  func.func @transform_2(%arg0: i32) -> (i32, i32, i32) {
    %c0_i32 = arith.constant 0 : i32
    %c0_i32_0 = arith.constant 0 : i32
    %c0_i32_1 = arith.constant 0 : i32
    %c0_i32_2 = arith.constant 0 : i32
    return %c0_i32, %c0_i32_0, %c0_i32_1 : i32, i32, i32
  }
  func.func @transform_3(%arg0: i32) -> (i32, i32, i32) {
    %c0_i32 = arith.constant 0 : i32
    %c0_i32_0 = arith.constant 0 : i32
    %c0_i32_1 = arith.constant 0 : i32
    %c0_i32_2 = arith.constant 0 : i32
    return %c0_i32, %c0_i32_0, %c0_i32_1 : i32, i32, i32
  }
  func.func @transform_4(%arg0: i32) -> (i32, i32) {
    %c0_i32 = arith.constant 0 : i32
    %c0_i32_0 = arith.constant 0 : i32
    return %arg0, %c0_i32 : i32, i32
  }
}

</mosaic_0001>

<bundles_post_ra>
// kernel: tpu_custom_call.1
= control target key start
LH: loop header
LB: loop body
LE: loop exit
PB: predicated region body
PF: predicated region fallthrough
CT: control target
= control target key end

     0   :  { %9 = vsyncpa [#allocation3], 0  ;;  %s2393_s0 = inlined_call_operand.vmem [shape: bf16[256,16], index: 0, kind: input, shape index: {}]   ;;  %s2394_s1 = inlined_call_operand.vmem [shape: bf16[16,128], index: 1, kind: input, shape index: {}]   ;;  %s2395_s2 = inlined_call_operand.hbm [shape: bf16[6,128,128], index: 2, kind: input, shape index: {}]   ;;  %s2396_s3 = inlined_call_operand.vmem [shape: f32[7,1,128], index: 3, kind: input, shape index: {}]   ;;  %s2397_s4 = inlined_call_operand.hbm [shape: f32[256,128], index: 4, kind: output, shape index: {}]  }
   0x1   :  { %10 = vsyncpa [#allocation4], 0  ;;  %s19_s17 = sshll.u32 %s2395_s2, 4  ;;  %s2018_s18 = smov [#allocation2]   ;;  %s20_s17 = int_to_ptr.hbm [resolvable:$true] %s19_s17 }
   0x2   :  { %s21_s19 = sshll.u32 %s2018_s18, 4  ;;  %s2019_s20 = smov 64   ;;  %s22_s19 = int_to_ptr.vmem [resolvable:$true] %s21_s19 }
   0x3   :  { %s2020_s21 = smov 4  }
   0x4   :  { %27 = dma.hbm_to_vmem [thread:$0]  %s20_s17, 6144, %s22_s19, [#allocation3], %s2019_s20, %s2019_s20, %s2020_s21  }
   0x5   :  { %2014 = dma.done.wait [#allocation3], 6144  }
   0x6   :  { %2015 = vsyncadd [#allocation3], 4294961152  ;;  %v1887_v0 = vld [vmem:[%s2394_s1] sm:$0xff]  ;;  %vm159_vm0 = vcmask 130048   ;;  %v1872_v2 = vld [vmem:[%s2393_s0 + $0x8] sm:$0xff]  ;;  %s1576_s16 = sshll.u32 %s2397_s4, 4  ;;  %s1577_s16 = int_to_ptr.hbm [resolvable:$true] %s1576_s16 }
   0x7   :  { %v1871_v1 = vld [vmem:[%s2393_s0] sm:$0xff]  ;;  %215 = vmatpush.bf16.msra.mxu0 %v1887_v0  ;;  %1936 = vmatpush.bf16.msra.mxu3 %v1887_v0  ;;  %v1873_v3 = vld [vmem:[%s2393_s0 + $0x10] sm:$0xff]  ;;  %v1874_v4 = vld [vmem:[%s2393_s0 + $0x18] sm:$0xff]  ;;  %s2022_s17 = smov 128   ;;  %s2023_s18 = smov 8  }
   0x8   :  { %v1875_v5 = vld [vmem:[%s2393_s0 + $0x20] sm:$0xff]  ;;  %v1895_v6 = vld [vmem:[#allocation2 + $0x38] sm:$0xff]  ;;  %v1876_v7 = vld [vmem:[%s2393_s0 + $0x28] sm:$0xff] }
   0x9   :  { %414 = vmatpush.bf16.msra.mxu1 %v1895_v6  ;;  %v1894_v8 = vld [vmem:[#allocation2 + $0x30] sm:$0xff]  ;;  %v1893_v9 = vld [vmem:[#allocation2 + $0x28] sm:$0xff]  ;;  %v1892_v10 = vld [vmem:[#allocation2 + $0x20] sm:$0xff] }
   0xa   :  { %1657 = vmatmul.msk.bf16.vlgmr.msra.gmra.mxu0 %vm159_vm0, %v1871_v1  ;;  %v1891_v11 = vld [vmem:[#allocation2 + $0x18] sm:$0xff]  ;;  %v1877_v12 = vld [vmem:[%s2393_s0 + $0x30] sm:$0xff]  ;;  %v1889_v14 = vld [vmem:[#allocation2 + $0x8] sm:$0xff] }
   0xb   :  { %1937 = vmatpush.bf16.msrb.mxu3 %v1895_v6  ;;  %v1890_v13 = vld [vmem:[#allocation2 + $0x10] sm:$0xff]  ;;  %v1888_v15 = vld [vmem:[#allocation2] sm:$0xff]  ;;  %v1878_v16 = vld [vmem:[%s2393_s0 + $0x38] sm:$0xff] }
   0xc   :  { %v1879_v17 = vld [vmem:[%s2393_s0 + $0x40] sm:$0xff]  ;;  %v1880_v26 = vld [vmem:[%s2393_s0 + $0x48] sm:$0xff]  ;;  %v1881_v34 = vld [vmem:[%s2393_s0 + $0x50] sm:$0xff] }
   0xd   :  { %415 = vmatpush.bf16.msra.mxu1 %v1894_v8  ;;  %v2093_v19 = vld [vmem:[%s2396_s3] ss:$0 sm:$0xff]  ;;  %v1884_v36 = vld [vmem:[%s2393_s0 + $0x68] sm:$0xff]  ;;  %v1882_v43 = vld [vmem:[%s2393_s0 + $0x58] sm:$0xff] }
   0xe   :  { %1670 = vmatmul.msk.bf16.vlgmr.msra.gmra.mxu3 %vm159_vm0, %v1884_v36  ;;  %v1885_v45 = vld [vmem:[%s2393_s0 + $0x70] sm:$0xff]  ;;  %v1883_v52 = vld [vmem:[%s2393_s0 + $0x60] sm:$0xff]  ;;  %v1886_v54 = vld [vmem:[%s2393_s0 + $0x78] sm:$0xff] }
   0xf   :  { %1938 = vmatpush.bf16.msrb.mxu3 %v1894_v8  ;;  %v1903_v1 = vld [vmem:[#allocation2 + $0x78] sm:$0xff]  ;;  %v1900_v8 = vld [vmem:[#allocation2 + $0x60] sm:$0xff] }
  0x10   :  { %621 = vmatpush.bf16.msra.mxu2 %v1903_v1 }
  0x11   :  { %416 = vmatpush.bf16.msra.mxu1 %v1893_v9 }
  0x13   :  { %1939 = vmatpush.bf16.msrb.mxu3 %v1893_v9 }
  0x15   :  { %417 = vmatpush.bf16.msra.mxu1 %v1892_v10 }
  0x17   :  { %1940 = vmatpush.bf16.msrb.mxu3 %v1892_v10 }
  0x19   :  { %418 = vmatpush.bf16.msra.mxu1 %v1891_v11 }
  0x1a   :  { %1658 = vmatmul.msk.bf16.gmra.mxu0 %vm159_vm0, %v1872_v2 }
  0x1b   :  { %1941 = vmatpush.bf16.msrb.mxu3 %v1891_v11 }
  0x1d   :  { %419 = vmatpush.bf16.msra.mxu1 %v1890_v13 }
  0x1e   :  { %1671 = vmatmul.msk.bf16.gmra.mxu3 %vm159_vm0, %v1885_v45 }
  0x1f   :  { %1942 = vmatpush.bf16.msrb.mxu3 %v1890_v13 }
  0x21   :  { %420 = vmatpush.bf16.msra.mxu1 %v1889_v14 }
  0x23   :  { %1943 = vmatpush.bf16.msrb.mxu3 %v1889_v14 }
  0x25   :  { %421 = vmatpush.bf16.msra.mxu1 %v1888_v15 }
  0x27   :  { %1944 = vmatpush.bf16.msrb.mxu3 %v1888_v15 }
  0x2a   :  { %1659 = vmatmul.msk.bf16.gmra.mxu0 %vm159_vm0, %v1873_v3 }
  0x2b   :  { %1945 = vmatpush.bf16.msra.mxu3 %v1903_v1 }
  0x2e   :  { %1672 = vmatmul.msk.bf16.gmra.mxu3 %vm159_vm0, %v1886_v54 }
  0x3a   :  { %1660 = vmatmul.msk.bf16.gmra.mxu0 %vm159_vm0, %v1874_v4 }
  0x4a   :  { %1661 = vmatmul.msk.bf16.gmra.mxu0 %vm159_vm0, %v1875_v5  ;;  %v1902_v5 = vld [vmem:[#allocation2 + $0x70] sm:$0xff] }
  0x4b   :  { %622 = vmatpush.bf16.msra.mxu2 %v1902_v5  ;;  %1946 = vmatpush.bf16.msra.mxu3 %v1902_v5 }
  0x5a   :  { %1662 = vmatmul.msk.bf16.gmra.mxu0 %vm159_vm0, %v1876_v7  ;;  %v1901_v7 = vld [vmem:[#allocation2 + $0x68] sm:$0xff] }
  0x5b   :  { %623 = vmatpush.bf16.msra.mxu2 %v1901_v7  ;;  %1947 = vmatpush.bf16.msra.mxu3 %v1901_v7 }
  0x5f   :  { %624 = vmatpush.bf16.msra.mxu2 %v1900_v8  ;;  %1948 = vmatpush.bf16.msra.mxu3 %v1900_v8 }
  0x6a   :  { %1663 = vmatmul.msk.bf16.gmra.mxu0 %vm159_vm0, %v1877_v12  ;;  %v1899_v12 = vld [vmem:[#allocation2 + $0x58] sm:$0xff] }
  0x6b   :  { %625 = vmatpush.bf16.msra.mxu2 %v1899_v12  ;;  %1949 = vmatpush.bf16.msra.mxu3 %v1899_v12 }
  0x7a   :  { %1664 = vmatmul.msk.bf16.gmra.mxu0 %vm159_vm0, %v1878_v16  ;;  %v1898_v16 = vld [vmem:[#allocation2 + $0x50] sm:$0xff] }
  0x7b   :  { %626 = vmatpush.bf16.msra.mxu2 %v1898_v16  ;;  %1950 = vmatpush.bf16.msra.mxu3 %v1898_v16 }
  0x87   :  { %v217_v18 = vpop.f32.mrf.mxu0 }
  0x88   :  { %v218_v20 = vadd.f32 %v2093_v19, %v217_v18  ;;  %v1897_v18 = vld [vmem:[#allocation2 + $0x48] sm:$0xff] }
  0x89   :  { %627 = vmatpush.bf16.msra.mxu2 %v1897_v18  ;;  %1951 = vmatpush.bf16.msra.mxu3 %v1897_v18 }
  0x8a   :  { %1665 = vmatmul.msk.bf16.gmra.mxu0 %vm159_vm0, %v1879_v17  ;;  %v297_v23 = vmax.f32 %v218_v20, 0.0  ;;  %v1896_v20 = vld [vmem:[#allocation2 + $0x40] sm:$0xff] }
  0x8d   :  { %628 = vmatpush.bf16.msra.mxu2 %v1896_v20  ;;  %1952 = vmatpush.bf16.msra.mxu3 %v1896_v20 }
  0x8f   :  { %v219_v21 = vpop.f32.mrf.mxu0 }
  0x90   :  { %v220_v22 = vadd.f32 %v2093_v19, %v219_v21 }
  0x92   :  { %v298_v24 = vmax.f32 %v220_v22, 0.0 }
  0x94   :  { %v345_v25 = vpack.c.bf16 %v298_v24, %v297_v23 }
  0x96   :  { %422 = vmatmul.bf16.vlgmr.msra.gmra.mxu1 %v345_v25 }
  0x97   :  { %v222_v27 = vpop.f32.mrf.mxu0 }
  0x98   :  { %v223_v28 = vadd.f32 %v2093_v19, %v222_v27 }
  0x9a   :  { %1666 = vmatmul.msk.bf16.gmra.mxu0 %vm159_vm0, %v1880_v26  ;;  %v299_v31 = vmax.f32 %v223_v28, 0.0 }
  0x9f   :  { %v224_v29 = vpop.f32.mrf.mxu0 }
  0xa0   :  { %v225_v30 = vadd.f32 %v2093_v19, %v224_v29 }
  0xa2   :  { %v300_v32 = vmax.f32 %v225_v30, 0.0 }
  0xa4   :  { %v346_v33 = vpack.c.bf16 %v300_v32, %v299_v31 }
  0xa6   :  { %427 = vmatmul.bf16.gmra.mxu1 %v346_v33 }
  0xa7   :  { %v227_v35 = vpop.f32.mrf.mxu0 }
  0xa8   :  { %v228_v37 = vadd.f32 %v2093_v19, %v227_v35  ;;  %v2145_v35 = vld [vmem:[%s2396_s3 + $0x1] ss:$0 sm:$0xff] }
  0xaa   :  { %1667 = vmatmul.msk.bf16.gmra.mxu0 %vm159_vm0, %v1881_v34  ;;  %v301_v40 = vmax.f32 %v228_v37, 0.0 }
  0xaf   :  { %v229_v38 = vpop.f32.mrf.mxu0 }
  0xb0   :  { %v230_v39 = vadd.f32 %v2093_v19, %v229_v38 }
  0xb2   :  { %v302_v41 = vmax.f32 %v230_v39, 0.0 }
  0xb4   :  { %v347_v42 = vpack.c.bf16 %v302_v41, %v301_v40 }
  0xb6   :  { %432 = vmatmul.bf16.gmra.mxu1 %v347_v42 }
  0xb7   :  { %v232_v44 = vpop.f32.mrf.mxu0 }
  0xb8   :  { %v233_v46 = vadd.f32 %v2093_v19, %v232_v44 }
  0xba   :  { %1668 = vmatmul.msk.bf16.gmra.mxu0 %vm159_vm0, %v1882_v43  ;;  %v303_v49 = vmax.f32 %v233_v46, 0.0 }
  0xbf   :  { %v234_v47 = vpop.f32.mrf.mxu0 }
  0xc0   :  { %v235_v48 = vadd.f32 %v2093_v19, %v234_v47 }
  0xc2   :  { %v304_v50 = vmax.f32 %v235_v48, 0.0 }
  0xc4   :  { %v348_v51 = vpack.c.bf16 %v304_v50, %v303_v49 }
  0xc6   :  { %437 = vmatmul.bf16.gmra.mxu1 %v348_v51 }
  0xc7   :  { %v237_v53 = vpop.f32.mrf.mxu0 }
  0xc8   :  { %v238_v55 = vadd.f32 %v2093_v19, %v237_v53 }
  0xca   :  { %1669 = vmatmul.msk.bf16.gmra.mxu0 %vm159_vm0, %v1883_v52  ;;  %v305_v58 = vmax.f32 %v238_v55, 0.0 }
  0xcf   :  { %v239_v56 = vpop.f32.mrf.mxu0 }
  0xd0   :  { %v240_v57 = vadd.f32 %v2093_v19, %v239_v56 }
  0xd2   :  { %v306_v59 = vmax.f32 %v240_v57, 0.0 }
  0xd4   :  { %v349_v60 = vpack.c.bf16 %v306_v59, %v305_v58 }
  0xd6   :  { %442 = vmatmul.bf16.gmra.mxu1 %v349_v60 }
  0xd7   :  { %v242_v61 = vpop.f32.mrf.mxu0 }
  0xd8   :  { %v243_v62 = vadd.f32 %v2093_v19, %v242_v61 }
  0xda   :  { %v307_v2 = vmax.f32 %v243_v62, 0.0 }
  0xdf   :  { %v244_v63 = vpop.f32.mrf.mxu0 }
  0xe0   :  { %v245_v0 = vadd.f32 %v2093_v19, %v244_v63 }
  0xe2   :  { %v308_v3 = vmax.f32 %v245_v0, 0.0 }
  0xe4   :  { %v350_v4 = vpack.c.bf16 %v308_v3, %v307_v2 }
  0xe6   :  { %447 = vmatmul.bf16.gmra.mxu1 %v350_v4 }
  0xe7   :  { %v247_v6 = vpop.f32.mrf.mxu0 }
  0xe8   :  { %v248_v9 = vadd.f32 %v2093_v19, %v247_v6 }
  0xea   :  { %v309_v13 = vmax.f32 %v248_v9, 0.0 }
  0xef   :  { %v249_v10 = vpop.f32.mrf.mxu0 }
  0xf0   :  { %v250_v11 = vadd.f32 %v2093_v19, %v249_v10 }
  0xf2   :  { %v310_v14 = vmax.f32 %v250_v11, 0.0 }
  0xf4   :  { %v351_v15 = vpack.c.bf16 %v310_v14, %v309_v13 }
  0xf6   :  { %452 = vmatmul.bf16.gmra.mxu1 %v351_v15  ;;  %v282_v15 = vpop.f32.mrf.mxu3 }
  0xf7   :  { %v252_v17 = vpop.f32.mrf.mxu0 }
  0xf8   :  { %v253_v21 = vadd.f32 %v2093_v19, %v252_v17 }
  0xfa   :  { %v311_v24 = vmax.f32 %v253_v21, 0.0 }
  0xff   :  { %v254_v22 = vpop.f32.mrf.mxu0 }
 0x100   :  { %v255_v23 = vadd.f32 %v2093_v19, %v254_v22 }
 0x102   :  { %v312_v25 = vmax.f32 %v255_v23, 0.0 }
 0x104   :  { %v352_v26 = vpack.c.bf16 %v312_v25, %v311_v24 }
 0x106   :  { %457 = vmatmul.bf16.gmra.mxu1 %v352_v26  ;;  %v284_v26 = vpop.f32.mrf.mxu3 }
 0x107   :  { %v257_v27 = vpop.f32.mrf.mxu0 }
 0x108   :  { %v258_v28 = vadd.f32 %v2093_v19, %v257_v27 }
 0x10a   :  { %v313_v31 = vmax.f32 %v258_v28, 0.0 }
 0x10f   :  { %v259_v29 = vpop.f32.mrf.mxu0 }
 0x110   :  { %v260_v30 = vadd.f32 %v2093_v19, %v259_v29 }
 0x112   :  { %v314_v32 = vmax.f32 %v260_v30, 0.0 }
 0x113   :  { %v423_v33 = vpop.f32.mrf.mxu1 }
 0x114   :  { %v353_v34 = vpack.c.bf16 %v314_v32, %v313_v31  ;;  %v424_v37 = vadd.f32 %v2145_v35, %v423_v33  ;;  %v287_v33 = vpop.f32.mrf.mxu3 }
 0x116   :  { %462 = vmatmul.bf16.gmra.mxu1 %v353_v34  ;;  %v503_v40 = vmax.f32 %v424_v37, 0.0  ;;  %v283_v34 = vadd.f32 %v2093_v19, %v282_v15 }
 0x117   :  { %v262_v36 = vpop.f32.mrf.mxu0 }
 0x118   :  { %v263_v41 = vadd.f32 %v2093_v19, %v262_v36  ;;  %v285_v36 = vadd.f32 %v2093_v19, %v284_v26 }
 0x11a   :  { %v315_v46 = vmax.f32 %v263_v41, 0.0  ;;  %v324_v41 = vmax.f32 %v285_v36, 0.0 }
 0x11b   :  { %v425_v38 = vpop.f32.mrf.mxu1 }
 0x11c   :  { %v426_v39 = vadd.f32 %v2145_v35, %v425_v38 }
 0x11e   :  { %v504_v42 = vmax.f32 %v426_v39, 0.0 }
 0x11f   :  { %v264_v43 = vpop.f32.mrf.mxu0 }
 0x120   :  { %v265_v44 = vadd.f32 %v2093_v19, %v264_v43  ;;  %v552_v45 = vpack.c.bf16 %v504_v42, %v503_v40  ;;  %v323_v40 = vmax.f32 %v283_v34, 0.0 }
 0x122   :  { %v316_v47 = vmax.f32 %v265_v44, 0.0  ;;  %629 = vmatmul.bf16.vlgmr.msra.gmra.mxu2 %v552_v45  ;;  %v358_v44 = vpack.c.bf16 %v324_v41, %v323_v40  ;;  %v289_v45 = vpop.f32.mrf.mxu3  ;;  %v1919_v41 = vld [vmem:[#allocation2 + $0xf8] sm:$0xff] }
 0x123   :  { %v428_v48 = vpop.f32.mrf.mxu1  ;;  %1035 = vmatpush.bf16.msrb.mxu0 %v1919_v41 }
 0x124   :  { %v354_v49 = vpack.c.bf16 %v316_v47, %v315_v46  ;;  %v429_v51 = vadd.f32 %v2145_v35, %v428_v48  ;;  %v288_v48 = vadd.f32 %v2093_v19, %v287_v33 }
 0x126   :  { %467 = vmatmul.bf16.gmra.mxu1 %v354_v49  ;;  %v505_v54 = vmax.f32 %v429_v51, 0.0  ;;  %v290_v49 = vadd.f32 %v2093_v19, %v289_v45  ;;  %v1910_v45 = vld [vmem:[#allocation2 + $0xb0] sm:$0xff] }
 0x127   :  { %v267_v50 = vpop.f32.mrf.mxu0 }
 0x128   :  { %v268_v55 = vadd.f32 %v2093_v19, %v267_v50 }
 0x12a   :  { %v317_v60 = vmax.f32 %v268_v55, 0.0  ;;  %v326_v55 = vmax.f32 %v290_v49, 0.0  ;;  %v1908_v49 = vld [vmem:[#allocation2 + $0xa0] sm:$0xff] }
 0x12b   :  { %v430_v52 = vpop.f32.mrf.mxu1 }
 0x12c   :  { %v431_v53 = vadd.f32 %v2145_v35, %v430_v52 }
 0x12e   :  { %v506_v56 = vmax.f32 %v431_v53, 0.0  ;;  %v292_v53 = vpop.f32.mrf.mxu3 }
 0x12f   :  { %v269_v57 = vpop.f32.mrf.mxu0 }
 0x130   :  { %v270_v58 = vadd.f32 %v2093_v19, %v269_v57  ;;  %v553_v59 = vpack.c.bf16 %v506_v56, %v505_v54  ;;  %v325_v54 = vmax.f32 %v288_v48, 0.0 }
 0x132   :  { %v318_v61 = vmax.f32 %v270_v58, 0.0  ;;  %634 = vmatmul.bf16.gmra.mxu2 %v553_v59  ;;  %v359_v58 = vpack.c.bf16 %v326_v55, %v325_v54  ;;  %v1918_v54 = vld [vmem:[#allocation2 + $0xf0] sm:$0xff] }
 0x133   :  { %v433_v62 = vpop.f32.mrf.mxu1  ;;  %1036 = vmatpush.bf16.msrb.mxu0 %v1918_v54 }
 0x134   :  { %v355_v63 = vpack.c.bf16 %v318_v61, %v317_v60  ;;  %v434_v1 = vadd.f32 %v2145_v35, %v433_v62  ;;  %v293_v62 = vadd.f32 %v2093_v19, %v292_v53 }
 0x136   :  { %472 = vmatmul.bf16.gmra.mxu1 %v355_v63  ;;  %v507_v4 = vmax.f32 %v434_v1, 0.0  ;;  %v294_v59 = vpop.f32.mrf.mxu3 }
 0x137   :  { %v272_v0 = vpop.f32.mrf.mxu0  ;;  %v295_v63 = vadd.f32 %v2093_v19, %v294_v59 }
 0x138   :  { %v273_v5 = vadd.f32 %v2093_v19, %v272_v0 }
 0x13a   :  { %v319_v10 = vmax.f32 %v273_v5, 0.0 }
 0x13b   :  { %v435_v2 = vpop.f32.mrf.mxu1 }
 0x13c   :  { %v436_v3 = vadd.f32 %v2145_v35, %v435_v2 }
 0x13e   :  { %v508_v6 = vmax.f32 %v436_v3, 0.0  ;;  %v327_v3 = vmax.f32 %v293_v62, 0.0 }
 0x13f   :  { %v274_v7 = vpop.f32.mrf.mxu0 }
 0x140   :  { %v275_v8 = vadd.f32 %v2093_v19, %v274_v7  ;;  %v554_v9 = vpack.c.bf16 %v508_v6, %v507_v4  ;;  %v328_v4 = vmax.f32 %v295_v63, 0.0 }
 0x142   :  { %v320_v11 = vmax.f32 %v275_v8, 0.0  ;;  %639 = vmatmul.bf16.gmra.mxu2 %v554_v9  ;;  %v360_v7 = vpack.c.bf16 %v328_v4, %v327_v3  ;;  %v1905_v3 = vld [vmem:[#allocation2 + $0x88] sm:$0xff] }
 0x143   :  { %v438_v12 = vpop.f32.mrf.mxu1 }
 0x144   :  { %v356_v13 = vpack.c.bf16 %v320_v11, %v319_v10  ;;  %v439_v16 = vadd.f32 %v2145_v35, %v438_v12 }
 0x146   :  { %477 = vmatmul.bf16.gmra.mxu1 %v356_v13  ;;  %v509_v20 = vmax.f32 %v439_v16, 0.0 }
 0x147   :  { %v277_v14 = vpop.f32.mrf.mxu0 }
 0x148   :  { %v278_v21 = vadd.f32 %v2093_v19, %v277_v14 }
 0x14a   :  { %v321_v27 = vmax.f32 %v278_v21, 0.0 }
 0x14b   :  { %v440_v17 = vpop.f32.mrf.mxu1 }
 0x14c   :  { %v441_v18 = vadd.f32 %v2145_v35, %v440_v17 }
 0x14e   :  { %v510_v22 = vmax.f32 %v441_v18, 0.0 }
 0x14f   :  { %v279_v23 = vpop.f32.mrf.mxu0 }
 0x150   :  { %v280_v24 = vadd.f32 %v2093_v19, %v279_v23  ;;  %v555_v25 = vpack.c.bf16 %v510_v22, %v509_v20 }
 0x152   :  { %v322_v28 = vmax.f32 %v280_v24, 0.0  ;;  %644 = vmatmul.bf16.gmra.mxu2 %v555_v25 }
 0x153   :  { %v443_v29 = vpop.f32.mrf.mxu1 }
 0x154   :  { %v357_v30 = vpack.c.bf16 %v322_v28, %v321_v27  ;;  %v444_v31 = vadd.f32 %v2145_v35, %v443_v29 }
 0x156   :  { %482 = vmatmul.bf16.vlgmr.msrb.gmra.mxu3 %v357_v30  ;;  %v511_v38 = vmax.f32 %v444_v31, 0.0 }
 0x15b   :  { %v445_v32 = vpop.f32.mrf.mxu1 }
 0x15c   :  { %v446_v37 = vadd.f32 %v2145_v35, %v445_v32 }
 0x15e   :  { %v512_v39 = vmax.f32 %v446_v37, 0.0  ;;  %v1911_v37 = vld [vmem:[#allocation2 + $0xb8] sm:$0xff] }
 0x15f   :  { %828 = vmatpush.bf16.msrb.mxu3 %v1911_v37 }
 0x160   :  { %v556_v42 = vpack.c.bf16 %v512_v39, %v511_v38 }
 0x162   :  { %649 = vmatmul.bf16.gmra.mxu2 %v556_v42 }
 0x163   :  { %v448_v43 = vpop.f32.mrf.mxu1  ;;  %829 = vmatpush.bf16.msrb.mxu3 %v1910_v45 }
 0x164   :  { %v449_v46 = vadd.f32 %v2145_v35, %v448_v43 }
 0x166   :  { %487 = vmatmul.bf16.gmra.mxu3 %v358_v44  ;;  %v513_v51 = vmax.f32 %v449_v46, 0.0  ;;  %v1909_v46 = vld [vmem:[#allocation2 + $0xa8] sm:$0xff] }
 0x167   :  { %830 = vmatpush.bf16.msrb.mxu3 %v1909_v46 }
 0x16b   :  { %v450_v47 = vpop.f32.mrf.mxu1  ;;  %831 = vmatpush.bf16.msrb.mxu3 %v1908_v49 }
 0x16c   :  { %v451_v50 = vadd.f32 %v2145_v35, %v450_v47 }
 0x16e   :  { %v514_v52 = vmax.f32 %v451_v50, 0.0 }
 0x170   :  { %v557_v56 = vpack.c.bf16 %v514_v52, %v513_v51 }
 0x172   :  { %654 = vmatmul.bf16.gmra.mxu2 %v557_v56 }
 0x173   :  { %v453_v57 = vpop.f32.mrf.mxu1 }
 0x174   :  { %v454_v60 = vadd.f32 %v2145_v35, %v453_v57  ;;  %v1907_v57 = vld [vmem:[#allocation2 + $0x98] sm:$0xff] }
 0x175   :  { %832 = vmatpush.bf16.msrb.mxu3 %v1907_v57 }
 0x176   :  { %492 = vmatmul.bf16.gmra.mxu3 %v359_v58  ;;  %v515_v1 = vmax.f32 %v454_v60, 0.0 }
 0x17b   :  { %v455_v61 = vpop.f32.mrf.mxu1 }
 0x17c   :  { %v456_v0 = vadd.f32 %v2145_v35, %v455_v61  ;;  %v1906_v61 = vld [vmem:[#allocation2 + $0x90] sm:$0xff] }
 0x17d   :  { %833 = vmatpush.bf16.msrb.mxu3 %v1906_v61  ;;  %v1927_v61 = vld [vmem:[#allocation2 + $0x138] sm:$0xff] }
 0x17e   :  { %v516_v2 = vmax.f32 %v456_v0, 0.0  ;;  %1242 = vmatpush.bf16.msrb.mxu1 %v1927_v61  ;;  %v1924_v61 = vld [vmem:[#allocation2 + $0x120] sm:$0xff] }
 0x180   :  { %v558_v5 = vpack.c.bf16 %v516_v2, %v515_v1 }
 0x181   :  { %834 = vmatpush.bf16.msrb.mxu3 %v1905_v3 }
 0x182   :  { %659 = vmatmul.bf16.gmra.mxu2 %v558_v5 }
 0x183   :  { %v458_v6 = vpop.f32.mrf.mxu1 }
 0x184   :  { %v459_v8 = vadd.f32 %v2145_v35, %v458_v6 }
 0x186   :  { %497 = vmatmul.bf16.gmra.mxu3 %v360_v7  ;;  %v517_v11 = vmax.f32 %v459_v8, 0.0  ;;  %v1917_v7 = vld [vmem:[#allocation2 + $0xe8] sm:$0xff]  ;;  %v1904_v8 = vld [vmem:[#allocation2 + $0x80] sm:$0xff] }
 0x187   :  { %1037 = vmatpush.bf16.msrb.mxu0 %v1917_v7  ;;  %835 = vmatpush.bf16.msrb.mxu3 %v1904_v8 }
 0x18b   :  { %v460_v9 = vpop.f32.mrf.mxu1 }
 0x18c   :  { %v461_v10 = vadd.f32 %v2145_v35, %v460_v9 }
 0x18e   :  { %v518_v12 = vmax.f32 %v461_v10, 0.0 }
 0x190   :  { %v559_v13 = vpack.c.bf16 %v518_v12, %v517_v11 }
 0x192   :  { %664 = vmatmul.bf16.gmra.mxu2 %v559_v13 }
 0x193   :  { %v463_v19 = vpop.f32.mrf.mxu1 }
 0x194   :  { %v464_v14 = vadd.f32 %v2145_v35, %v463_v19 }
 0x196   :  { %v519_v17 = vmax.f32 %v464_v14, 0.0 }
 0x19b   :  { %v465_v15 = vpop.f32.mrf.mxu1 }
 0x19c   :  { %v466_v16 = vadd.f32 %v2145_v35, %v465_v15 }
 0x19e   :  { %v520_v18 = vmax.f32 %v466_v16, 0.0 }
 0x1a0   :  { %v560_v20 = vpack.c.bf16 %v520_v18, %v519_v17 }
 0x1a2   :  { %669 = vmatmul.bf16.gmra.mxu2 %v560_v20 }
 0x1a3   :  { %v468_v21 = vpop.f32.mrf.mxu1 }
 0x1a4   :  { %v469_v22 = vadd.f32 %v2145_v35, %v468_v21 }
 0x1a5   :  { %v630_v55 = vpop.f32.mrf.mxu2 }
 0x1a6   :  { %v521_v25 = vmax.f32 %v469_v22, 0.0 }
 0x1ab   :  { %v470_v23 = vpop.f32.mrf.mxu1 }
 0x1ac   :  { %v471_v24 = vadd.f32 %v2145_v35, %v470_v23 }
 0x1ad   :  { %v632_v59 = vpop.f32.mrf.mxu2 }
 0x1ae   :  { %v522_v26 = vmax.f32 %v471_v24, 0.0  ;;  %v1916_v24 = vld [vmem:[#allocation2 + $0xe0] sm:$0xff] }
 0x1af   :  { %1038 = vmatpush.bf16.msrb.mxu0 %v1916_v24 }
 0x1b0   :  { %v561_v27 = vpack.c.bf16 %v522_v26, %v521_v25  ;;  %v2196_v25 = vld [vmem:[%s2396_s3 + $0x2] ss:$0 sm:$0xff] }
 0x1b1   :  { %v633_v26 = vadd.f32 %v2196_v25, %v632_v59 }
 0x1b2   :  { %674 = vmatmul.bf16.gmra.mxu2 %v561_v27  ;;  %v631_v27 = vadd.f32 %v2196_v25, %v630_v55 }
 0x1b3   :  { %v473_v28 = vpop.f32.mrf.mxu1 }
 0x1b4   :  { %v474_v29 = vadd.f32 %v2145_v35, %v473_v28 }
 0x1b5   :  { %v635_v4 = vpop.f32.mrf.mxu2 }
 0x1b6   :  { %v523_v32 = vmax.f32 %v474_v29, 0.0  ;;  %v711_v29 = vmax.f32 %v633_v26, 0.0 }
 0x1bb   :  { %v475_v30 = vpop.f32.mrf.mxu1 }
 0x1bc   :  { %v476_v31 = vadd.f32 %v2145_v35, %v475_v30  ;;  %v710_v30 = vmax.f32 %v631_v27, 0.0 }
 0x1bd   :  { %v637_v11 = vpop.f32.mrf.mxu2 }
 0x1be   :  { %v524_v33 = vmax.f32 %v476_v31, 0.0 }
 0x1c0   :  { %v562_v34 = vpack.c.bf16 %v524_v33, %v523_v32  ;;  %v638_v32 = vadd.f32 %v2196_v25, %v637_v11  ;;  %v636_v33 = vadd.f32 %v2196_v25, %v635_v4 }
 0x1c2   :  { %679 = vmatmul.bf16.gmra.mxu2 %v562_v34  ;;  %v1915_v34 = vld [vmem:[#allocation2 + $0xd8] sm:$0xff]  ;;  %v712_v37 = vmax.f32 %v636_v33, 0.0 }
 0x1c3   :  { %v478_v36 = vpop.f32.mrf.mxu1  ;;  %1039 = vmatpush.bf16.msrb.mxu0 %v1915_v34 }
 0x1c4   :  { %v479_v38 = vadd.f32 %v2145_v35, %v478_v36  ;;  %v713_v36 = vmax.f32 %v638_v32, 0.0 }
 0x1c5   :  { %v640_v15 = vpop.f32.mrf.mxu2 }
 0x1c6   :  { %v525_v42 = vmax.f32 %v479_v38, 0.0 }
 0x1cb   :  { %v480_v39 = vpop.f32.mrf.mxu1 }
 0x1cc   :  { %v481_v40 = vadd.f32 %v2145_v35, %v480_v39  ;;  %v760_v39 = vpack.c.bf16 %v713_v36, %v712_v37 }
 0x1cd   :  { %v642_v23 = vpop.f32.mrf.mxu2 }
 0x1ce   :  { %v526_v43 = vmax.f32 %v481_v40, 0.0  ;;  %v643_v40 = vadd.f32 %v2196_v25, %v642_v23 }
 0x1d0   :  { %v563_v44 = vpack.c.bf16 %v526_v43, %v525_v42  ;;  %v641_v42 = vadd.f32 %v2196_v25, %v640_v15  ;;  %v715_v43 = vmax.f32 %v643_v40, 0.0  ;;  %v1912_v15 = vld [vmem:[#allocation2 + $0xc0] sm:$0xff] }
 0x1d2   :  { %684 = vmatmul.bf16.gmra.mxu2 %v563_v44  ;;  %v714_v44 = vmax.f32 %v641_v42, 0.0 }
 0x1d4   :  { %v761_v45 = vpack.c.bf16 %v715_v43, %v714_v44 }
 0x1d5   :  { %v645_v28 = vpop.f32.mrf.mxu2 }
 0x1d6   :  { %v646_v49 = vadd.f32 %v2196_v25, %v645_v28 }
 0x1d9   :  { %v483_v47 = vpop.f32.mrf.mxu3 }
 0x1da   :  { %v484_v48 = vadd.f32 %v2145_v35, %v483_v47 }
 0x1dc   :  { %v527_v52 = vmax.f32 %v484_v48, 0.0  ;;  %v1914_v48 = vld [vmem:[#allocation2 + $0xd0] sm:$0xff] }
 0x1dd   :  { %v647_v31 = vpop.f32.mrf.mxu2  ;;  %1040 = vmatpush.bf16.msrb.mxu0 %v1914_v48 }
 0x1de   :  { %v648_v47 = vadd.f32 %v2196_v25, %v647_v31 }
 0x1e1   :  { %v485_v50 = vpop.f32.mrf.mxu3 }
 0x1e2   :  { %v486_v51 = vadd.f32 %v2145_v35, %v485_v50  ;;  %v717_v50 = vmax.f32 %v648_v47, 0.0 }
 0x1e4   :  { %v528_v53 = vmax.f32 %v486_v51, 0.0 }
 0x1e5   :  { %v650_v38 = vpop.f32.mrf.mxu2 }
 0x1e6   :  { %v564_v56 = vpack.c.bf16 %v528_v53, %v527_v52  ;;  %v716_v52 = vmax.f32 %v646_v49, 0.0 }
 0x1e8   :  { %689 = vmatmul.bf16.vlgmr.msra.gmra.mxu3 %v564_v56  ;;  %v762_v53 = vpack.c.bf16 %v717_v50, %v716_v52  ;;  %v651_v56 = vadd.f32 %v2196_v25, %v650_v38 }
 0x1e9   :  { %v488_v58 = vpop.f32.mrf.mxu3 }
 0x1ea   :  { %v489_v60 = vadd.f32 %v2145_v35, %v488_v58  ;;  %v718_v58 = vmax.f32 %v651_v56, 0.0 }
 0x1ec   :  { %v529_v0 = vmax.f32 %v489_v60, 0.0  ;;  %v1913_v60 = vld [vmem:[#allocation2 + $0xc8] sm:$0xff] }
 0x1ed   :  { %v652_v41 = vpop.f32.mrf.mxu2  ;;  %1041 = vmatpush.bf16.msrb.mxu0 %v1913_v60  ;;  %v2236_v60 = vld [vmem:[%s2396_s3 + $0x3] ss:$0 sm:$0xff] }
 0x1ee   :  { %v653_v55 = vadd.f32 %v2196_v25, %v652_v41  ;;  %v1925_v41 = vld [vmem:[#allocation2 + $0x128] sm:$0xff] }
 0x1f0   :  { %v719_v57 = vmax.f32 %v653_v55, 0.0 }
 0x1f1   :  { %v490_v62 = vpop.f32.mrf.mxu3  ;;  %1042 = vmatpush.bf16.msrb.mxu0 %v1912_v15 }
 0x1f2   :  { %v491_v63 = vadd.f32 %v2145_v35, %v490_v62  ;;  %v763_v59 = vpack.c.bf16 %v719_v57, %v718_v58 }
 0x1f4   :  { %v530_v1 = vmax.f32 %v491_v63, 0.0 }
 0x1f5   :  { %v655_v46 = vpop.f32.mrf.mxu2 }
 0x1f6   :  { %v565_v2 = vpack.c.bf16 %v530_v1, %v529_v0  ;;  %v656_v1 = vadd.f32 %v2196_v25, %v655_v46 }
 0x1f8   :  { %694 = vmatmul.bf16.gmra.mxu3 %v565_v2 }
 0x1f9   :  { %v493_v5 = vpop.f32.mrf.mxu3 }
 0x1fa   :  { %v494_v6 = vadd.f32 %v2145_v35, %v493_v5 }
 0x1fc   :  { %v531_v12 = vmax.f32 %v494_v6, 0.0  ;;  %v720_v6 = vmax.f32 %v656_v1, 0.0 }
 0x1fd   :  { %v657_v51 = vpop.f32.mrf.mxu2 }
 0x1fe   :  { %v658_v0 = vadd.f32 %v2196_v25, %v657_v51 }
 0x200   :  { %v721_v3 = vmax.f32 %v658_v0, 0.0 }
 0x201   :  { %v495_v9 = vpop.f32.mrf.mxu3 }
 0x202   :  { %v496_v10 = vadd.f32 %v2145_v35, %v495_v9 }
 0x204   :  { %v532_v13 = vmax.f32 %v496_v10, 0.0  ;;  %v764_v10 = vpack.c.bf16 %v721_v3, %v720_v6 }
 0x205   :  { %v660_v54 = vpop.f32.mrf.mxu2 }
 0x206   :  { %v566_v19 = vpack.c.bf16 %v532_v13, %v531_v12 }
 0x208   :  { %699 = vmatmul.bf16.gmra.mxu3 %v566_v19 }
 0x209   :  { %v498_v14 = vpop.f32.mrf.mxu3 }
 0x20a   :  { %v499_v16 = vadd.f32 %v2145_v35, %v498_v14  ;;  %v1926_v14 = vld [vmem:[#allocation2 + $0x130] sm:$0xff] }
 0x20b   :  { %1243 = vmatpush.bf16.msrb.mxu1 %v1926_v14 }
 0x20c   :  { %v533_v20 = vmax.f32 %v499_v16, 0.0  ;;  %v661_v16 = vadd.f32 %v2196_v25, %v660_v54 }
 0x20d   :  { %v662_v62 = vpop.f32.mrf.mxu2 }
 0x20e   :  { %v663_v19 = vadd.f32 %v2196_v25, %v662_v62 }
 0x20f   :  { %1244 = vmatpush.bf16.msrb.mxu1 %v1925_v41 }
 0x211   :  { %v500_v17 = vpop.f32.mrf.mxu3 }
 0x212   :  { %v501_v18 = vadd.f32 %v2145_v35, %v500_v17  ;;  %v759_v35 = vpack.c.bf16 %v711_v29, %v710_v30  ;;  %v723_v17 = vmax.f32 %v663_v19, 0.0 }
 0x213   :  { %1245 = vmatpush.bf16.msrb.mxu1 %v1924_v61 }
 0x214   :  { %v534_v21 = vmax.f32 %v501_v18, 0.0 }
 0x215   :  { %v665_v2 = vpop.f32.mrf.mxu2 }
 0x216   :  { %v567_v22 = vpack.c.bf16 %v534_v21, %v533_v20  ;;  %v722_v21 = vmax.f32 %v661_v16, 0.0  ;;  %v666_v31 = vadd.f32 %v2196_v25, %v665_v2 }
 0x218   :  { %704 = vmatmul.bf16.gmra.mxu3 %v567_v22  ;;  %v765_v27 = vpack.c.bf16 %v723_v17, %v722_v21  ;;  %v724_v36 = vmax.f32 %v666_v31, 0.0 }
 0x21d   :  { %v667_v12 = vpop.f32.mrf.mxu2 }
 0x21e   :  { %v668_v30 = vadd.f32 %v2196_v25, %v667_v12 }
 0x220   :  { %v725_v32 = vmax.f32 %v668_v30, 0.0 }
 0x222   :  { %v766_v40 = vpack.c.bf16 %v725_v32, %v724_v36 }
 0x225   :  { %v670_v23 = vpop.f32.mrf.mxu2 }
 0x226   :  { %v671_v46 = vadd.f32 %v2196_v25, %v670_v23 }
 0x228   :  { %836 = vmatmul.bf16.vlgmr.msrb.gmra.mxu3 %v759_v35  ;;  %v726_v51 = vmax.f32 %v671_v46, 0.0 }
 0x22d   :  { %v672_v35 = vpop.f32.mrf.mxu2 }
 0x235   :  { %v675_v43 = vpop.f32.mrf.mxu2 }
 0x236   :  { %v676_v62 = vadd.f32 %v2196_v25, %v675_v43 }
 0x238   :  { %841 = vmatmul.bf16.gmra.mxu3 %v760_v39  ;;  %v728_v2 = vmax.f32 %v676_v62, 0.0 }
 0x23d   :  { %v677_v49 = vpop.f32.mrf.mxu2 }
 0x245   :  { %v680_v58 = vpop.f32.mrf.mxu2 }
 0x246   :  { %v681_v12 = vadd.f32 %v2196_v25, %v680_v58 }
 0x248   :  { %846 = vmatmul.bf16.gmra.mxu3 %v761_v45  ;;  %v673_v45 = vadd.f32 %v2196_v25, %v672_v35  ;;  %v730_v16 = vmax.f32 %v681_v12, 0.0  ;;  %v1933_v12 = vld [vmem:[#allocation2 + $0x168] sm:$0xff] }
 0x24a   :  { %v727_v47 = vmax.f32 %v673_v45, 0.0 }
 0x24c   :  { %v767_v55 = vpack.c.bf16 %v727_v47, %v726_v51 }
 0x258   :  { %851 = vmatmul.bf16.gmra.mxu3 %v762_v53 }
 0x268   :  { %856 = vmatmul.bf16.gmra.mxu3 %v763_v59  ;;  %v678_v59 = vadd.f32 %v2196_v25, %v677_v49 }
 0x26b   :  { %v690_v63 = vpop.f32.mrf.mxu3 }
 0x26c   :  { %v691_v4 = vadd.f32 %v2196_v25, %v690_v63  ;;  %v729_v63 = vmax.f32 %v678_v59, 0.0 }
 0x26e   :  { %v734_v8 = vmax.f32 %v691_v4, 0.0  ;;  %v768_v6 = vpack.c.bf16 %v729_v63, %v728_v2  ;;  %v1920_v2 = vld [vmem:[#allocation2 + $0x100] sm:$0xff] }
 0x273   :  { %v692_v5 = vpop.f32.mrf.mxu3 }
 0x274   :  { %v693_v7 = vadd.f32 %v2196_v25, %v692_v5 }
 0x276   :  { %v735_v9 = vmax.f32 %v693_v7, 0.0  ;;  %v682_v7 = vpop.f32.mrf.mxu2 }
 0x278   :  { %861 = vmatmul.bf16.gmra.mxu3 %v764_v10  ;;  %v2212_v11 = vpack.c.bf16 %v735_v9, %v734_v8  ;;  %v683_v10 = vadd.f32 %v2196_v25, %v682_v7 }
 0x27a   :  { %v731_v19 = vmax.f32 %v683_v10, 0.0 }
 0x27b   :  { %v695_v13 = vpop.f32.mrf.mxu3 }
 0x27c   :  { %v696_v18 = vadd.f32 %v2196_v25, %v695_v13  ;;  %v769_v21 = vpack.c.bf16 %v731_v19, %v730_v16 }
 0x27e   :  { %v736_v24 = vmax.f32 %v696_v18, 0.0  ;;  %v685_v13 = vpop.f32.mrf.mxu2 }
 0x283   :  { %v697_v20 = vpop.f32.mrf.mxu3 }
 0x284   :  { %v698_v22 = vadd.f32 %v2196_v25, %v697_v20 }
 0x286   :  { %v737_v26 = vmax.f32 %v698_v22, 0.0  ;;  %v1923_v22 = vld [vmem:[#allocation2 + $0x118] sm:$0xff] }
 0x287   :  { %1246 = vmatpush.bf16.msrb.mxu1 %v1923_v22 }
 0x288   :  { %866 = vmatmul.bf16.gmra.mxu3 %v765_v27  ;;  %v2218_v28 = vpack.c.bf16 %v737_v26, %v736_v24  ;;  %v687_v24 = vpop.f32.mrf.mxu2 }
 0x289   :  { %v688_v27 = vadd.f32 %v2196_v25, %v687_v24  ;;  %v1932_v24 = vld [vmem:[#allocation2 + $0x160] sm:$0xff] }
 0x28b   :  { %v700_v29 = vpop.f32.mrf.mxu3  ;;  %v733_v30 = vmax.f32 %v688_v27, 0.0 }
 0x28c   :  { %v701_v33 = vadd.f32 %v2196_v25, %v700_v29  ;;  %v686_v29 = vadd.f32 %v2196_v25, %v685_v13 }
 0x28e   :  { %v738_v38 = vmax.f32 %v701_v33, 0.0  ;;  %v732_v32 = vmax.f32 %v686_v29, 0.0 }
 0x293   :  { %v702_v34 = vpop.f32.mrf.mxu3 }
 0x294   :  { %v703_v37 = vadd.f32 %v2196_v25, %v702_v34 }
 0x296   :  { %v739_v39 = vmax.f32 %v703_v37, 0.0  ;;  %v770_v37 = vpack.c.bf16 %v733_v30, %v732_v32 }
 0x298   :  { %871 = vmatmul.bf16.gmra.mxu3 %v766_v40  ;;  %v2224_v42 = vpack.c.bf16 %v739_v39, %v738_v38  ;;  %v1922_v40 = vld [vmem:[#allocation2 + $0x110] sm:$0xff] }
 0x299   :  { %1247 = vmatpush.bf16.msrb.mxu1 %v1922_v40 }
 0x29b   :  { %v705_v44 = vpop.f32.mrf.mxu3 }
 0x29c   :  { %v706_v48 = vadd.f32 %v2196_v25, %v705_v44 }
 0x29e   :  { %v740_v53 = vmax.f32 %v706_v48, 0.0  ;;  %v1935_v48 = vld [vmem:[#allocation2 + $0x178] sm:$0xff] }
 0x29f   :  { %1449 = vmatpush.bf16.msrb.mxu2 %v1935_v48  ;;  %v1931_v48 = vld [vmem:[#allocation2 + $0x158] sm:$0xff] }
 0x2a3   :  { %v707_v50 = vpop.f32.mrf.mxu3 }
 0x2a4   :  { %v708_v52 = vadd.f32 %v2196_v25, %v707_v50 }
 0x2a6   :  { %v741_v54 = vmax.f32 %v708_v52, 0.0 }
 0x2a8   :  { %876 = vmatmul.bf16.gmra.mxu3 %v767_v55  ;;  %v2230_v56 = vpack.c.bf16 %v741_v54, %v740_v53  ;;  %v1921_v55 = vld [vmem:[#allocation2 + $0x108] sm:$0xff] }
 0x2a9   :  { %1248 = vmatpush.bf16.msrb.mxu1 %v1921_v55 }
 0x2ab   :  { %v837_v57 = vpop.f32.mrf.mxu3 }
 0x2ac   :  { %v838_v0 = vadd.f32 %v2236_v60, %v837_v57 }
 0x2ad   :  { %1249 = vmatpush.bf16.msrb.mxu1 %v1920_v2 }
 0x2ae   :  { %v917_v4 = vmax.f32 %v838_v0, 0.0  ;;  %v1934_v0 = vld [vmem:[#allocation2 + $0x170] sm:$0xff] }
 0x2af   :  { %1450 = vmatpush.bf16.msrb.mxu2 %v1934_v0 }
 0x2b3   :  { %v839_v1 = vpop.f32.mrf.mxu3  ;;  %1451 = vmatpush.bf16.msrb.mxu2 %v1933_v12 }
 0x2b4   :  { %v840_v3 = vadd.f32 %v2236_v60, %v839_v1 }
 0x2b6   :  { %v918_v5 = vmax.f32 %v840_v3, 0.0 }
 0x2b7   :  { %1452 = vmatpush.bf16.msrb.mxu2 %v1932_v24 }
 0x2b8   :  { %v966_v8 = vpack.c.bf16 %v918_v5, %v917_v4  ;;  %881 = vmatmul.bf16.gmra.mxu3 %v768_v6 }
 0x2ba   :  { %1043 = vmatmul.bf16.vlgmr.msrb.gmra.mxu0 %v966_v8 }
 0x2bb   :  { %v842_v9 = vpop.f32.mrf.mxu3  ;;  %1453 = vmatpush.bf16.msrb.mxu2 %v1931_v48 }
 0x2bc   :  { %v843_v14 = vadd.f32 %v2236_v60, %v842_v9 }
 0x2be   :  { %v919_v18 = vmax.f32 %v843_v14, 0.0 }
 0x2c3   :  { %v844_v15 = vpop.f32.mrf.mxu3 }
 0x2c4   :  { %v845_v17 = vadd.f32 %v2236_v60, %v844_v15 }
 0x2c6   :  { %v920_v20 = vmax.f32 %v845_v17, 0.0 }
 0x2c8   :  { %886 = vmatmul.bf16.gmra.mxu3 %v769_v21  ;;  %v967_v23 = vpack.c.bf16 %v920_v20, %v919_v18 }
 0x2ca   :  { %1048 = vmatmul.bf16.gmra.mxu0 %v967_v23  ;;  %v2268_v23 = vld [vmem:[%s2396_s3 + $0x4] ss:$0 sm:$0xff] }
 0x2cb   :  { %v847_v26 = vpop.f32.mrf.mxu3 }
 0x2cc   :  { %v848_v35 = vadd.f32 %v2236_v60, %v847_v26 }
 0x2ce   :  { %v921_v34 = vmax.f32 %v848_v35, 0.0 }
 0x2d3   :  { %v849_v31 = vpop.f32.mrf.mxu3 }
 0x2d4   :  { %v850_v33 = vadd.f32 %v2236_v60, %v849_v31 }
 0x2d6   :  { %v922_v36 = vmax.f32 %v850_v33, 0.0 }
 0x2d8   :  { %891 = vmatmul.bf16.gmra.mxu3 %v770_v37  ;;  %v968_v38 = vpack.c.bf16 %v922_v36, %v921_v34 }
 0x2da   :  { %1053 = vmatmul.bf16.gmra.mxu0 %v968_v38 }
 0x2db   :  { %v852_v39 = vpop.f32.mrf.mxu3 }
 0x2dc   :  { %v853_v41 = vadd.f32 %v2236_v60, %v852_v39 }
 0x2de   :  { %v923_v44 = vmax.f32 %v853_v41, 0.0 }
 0x2e3   :  { %v854_v43 = vpop.f32.mrf.mxu3 }
 0x2e4   :  { %v855_v25 = vadd.f32 %v2236_v60, %v854_v43 }
 0x2e6   :  { %v924_v45 = vmax.f32 %v855_v25, 0.0 }
 0x2e8   :  { %896 = vmatmul.bf16.gmra.mxu3 %v2212_v11  ;;  %v969_v46 = vpack.c.bf16 %v924_v45, %v923_v44 }
 0x2ea   :  { %1058 = vmatmul.bf16.gmra.mxu0 %v969_v46 }
 0x2eb   :  { %v857_v47 = vpop.f32.mrf.mxu3 }
 0x2ec   :  { %v858_v49 = vadd.f32 %v2236_v60, %v857_v47 }
 0x2ee   :  { %v925_v52 = vmax.f32 %v858_v49, 0.0 }
 0x2f3   :  { %v859_v50 = vpop.f32.mrf.mxu3 }
 0x2f4   :  { %v860_v51 = vadd.f32 %v2236_v60, %v859_v50 }
 0x2f6   :  { %v926_v53 = vmax.f32 %v860_v51, 0.0 }
 0x2f8   :  { %v970_v54 = vpack.c.bf16 %v926_v53, %v925_v52  ;;  %901 = vmatmul.bf16.gmra.mxu3 %v2218_v28 }
 0x2fa   :  { %1063 = vmatmul.bf16.gmra.mxu0 %v970_v54 }
 0x2fb   :  { %v862_v57 = vpop.f32.mrf.mxu3 }
 0x2fc   :  { %v863_v11 = vadd.f32 %v2236_v60, %v862_v57 }
 0x2fe   :  { %v927_v61 = vmax.f32 %v863_v11, 0.0 }
 0x303   :  { %v864_v58 = vpop.f32.mrf.mxu3 }
 0x304   :  { %v865_v59 = vadd.f32 %v2236_v60, %v864_v58 }
 0x306   :  { %v928_v62 = vmax.f32 %v865_v59, 0.0 }
 0x308   :  { %v971_v63 = vpack.c.bf16 %v928_v62, %v927_v61  ;;  %906 = vmatmul.bf16.gmra.mxu3 %v2224_v42 }
 0x30a   :  { %1068 = vmatmul.bf16.gmra.mxu0 %v971_v63 }
 0x30b   :  { %v867_v1 = vpop.f32.mrf.mxu3 }
 0x30c   :  { %v868_v28 = vadd.f32 %v2236_v60, %v867_v1 }
 0x30e   :  { %v929_v5 = vmax.f32 %v868_v28, 0.0 }
 0x313   :  { %v869_v3 = vpop.f32.mrf.mxu3 }
 0x314   :  { %v870_v4 = vadd.f32 %v2236_v60, %v869_v3 }
 0x316   :  { %v930_v6 = vmax.f32 %v870_v4, 0.0 }
 0x318   :  { %v972_v7 = vpack.c.bf16 %v930_v6, %v929_v5  ;;  %911 = vmatmul.bf16.gmra.mxu3 %v2230_v56  ;;  %v1930_v6 = vld [vmem:[#allocation2 + $0x150] sm:$0xff] }
 0x319   :  { %1454 = vmatpush.bf16.msrb.mxu2 %v1930_v6 }
 0x31a   :  { %1073 = vmatmul.bf16.gmra.mxu0 %v972_v7 }
 0x31b   :  { %v872_v8 = vpop.f32.mrf.mxu3 }
 0x31c   :  { %v873_v42 = vadd.f32 %v2236_v60, %v872_v8 }
 0x31e   :  { %v931_v13 = vmax.f32 %v873_v42, 0.0 }
 0x323   :  { %v874_v9 = vpop.f32.mrf.mxu3 }
 0x324   :  { %v875_v10 = vadd.f32 %v2236_v60, %v874_v9 }
 0x326   :  { %v932_v19 = vmax.f32 %v875_v10, 0.0 }
 0x328   :  { %v973_v14 = vpack.c.bf16 %v932_v19, %v931_v13 }
 0x32a   :  { %1078 = vmatmul.bf16.gmra.mxu0 %v973_v14 }
 0x32b   :  { %v877_v15 = vpop.f32.mrf.mxu3 }
 0x32c   :  { %v878_v16 = vadd.f32 %v2236_v60, %v877_v15 }
 0x32e   :  { %v933_v56 = vmax.f32 %v878_v16, 0.0 }
 0x333   :  { %v879_v17 = vpop.f32.mrf.mxu3 }
 0x334   :  { %v880_v18 = vadd.f32 %v2236_v60, %v879_v17 }
 0x336   :  { %v934_v20 = vmax.f32 %v880_v18, 0.0 }
 0x337   :  { %v1044_v21 = vpop.f32.mrf.mxu0 }
 0x338   :  { %v974_v22 = vpack.c.bf16 %v934_v20, %v933_v56  ;;  %v1045_v27 = vadd.f32 %v2268_v23, %v1044_v21 }
 0x33a   :  { %1083 = vmatmul.bf16.gmra.mxu0 %v974_v22  ;;  %v1124_v35 = vmax.f32 %v1045_v27, 0.0 }
 0x33b   :  { %v882_v26 = vpop.f32.mrf.mxu3 }
 0x33c   :  { %v883_v31 = vadd.f32 %v2236_v60, %v882_v26 }
 0x33e   :  { %v935_v37 = vmax.f32 %v883_v31, 0.0 }
 0x33f   :  { %v1046_v29 = vpop.f32.mrf.mxu0 }
 0x340   :  { %v1047_v30 = vadd.f32 %v2268_v23, %v1046_v29 }
 0x342   :  { %v1125_v32 = vmax.f32 %v1047_v30, 0.0 }
 0x343   :  { %v884_v33 = vpop.f32.mrf.mxu3 }
 0x344   :  { %v1173_v34 = vpack.c.bf16 %v1125_v32, %v1124_v35  ;;  %v885_v36 = vadd.f32 %v2236_v60, %v884_v33  ;;  %v1929_v32 = vld [vmem:[#allocation2 + $0x148] sm:$0xff] }
 0x345   :  { %1455 = vmatpush.bf16.msrb.mxu2 %v1929_v32 }
 0x346   :  { %v936_v38 = vmax.f32 %v885_v36, 0.0  ;;  %1250 = vmatmul.bf16.vlgmr.msrb.gmra.mxu1 %v1173_v34 }
 0x347   :  { %v1049_v39 = vpop.f32.mrf.mxu0 }
 0x348   :  { %v975_v40 = vpack.c.bf16 %v936_v38, %v935_v37  ;;  %v1050_v43 = vadd.f32 %v2268_v23, %v1049_v39 }
 0x34a   :  { %1088 = vmatmul.bf16.gmra.mxu0 %v975_v40  ;;  %v1126_v45 = vmax.f32 %v1050_v43, 0.0 }
 0x34b   :  { %v887_v41 = vpop.f32.mrf.mxu3 }
 0x34c   :  { %v888_v46 = vadd.f32 %v2236_v60, %v887_v41 }
 0x34e   :  { %v937_v52 = vmax.f32 %v888_v46, 0.0 }
 0x34f   :  { %v1051_v25 = vpop.f32.mrf.mxu0 }
 0x350   :  { %v1052_v44 = vadd.f32 %v2268_v23, %v1051_v25 }
 0x352   :  { %v1127_v47 = vmax.f32 %v1052_v44, 0.0 }
 0x353   :  { %v889_v49 = vpop.f32.mrf.mxu3 }
 0x354   :  { %v890_v50 = vadd.f32 %v2236_v60, %v889_v49  ;;  %v1174_v51 = vpack.c.bf16 %v1127_v47, %v1126_v45 }
 0x356   :  { %v938_v53 = vmax.f32 %v890_v50, 0.0  ;;  %1255 = vmatmul.bf16.gmra.mxu1 %v1174_v51 }
 0x357   :  { %v1054_v54 = vpop.f32.mrf.mxu0 }
 0x358   :  { %v976_v55 = vpack.c.bf16 %v938_v53, %v937_v52  ;;  %v1055_v11 = vadd.f32 %v2268_v23, %v1054_v54  ;;  %v1928_v52 = vld [vmem:[#allocation2 + $0x140] sm:$0xff] }
 0x359   :  { %1456 = vmatpush.bf16.msrb.mxu2 %v1928_v52 }
 0x35a   :  { %1093 = vmatmul.bf16.gmra.mxu0 %v976_v55  ;;  %v1128_v61 = vmax.f32 %v1055_v11, 0.0 }
 0x35b   :  { %v892_v57 = vpop.f32.mrf.mxu3 }
 0x35c   :  { %v893_v62 = vadd.f32 %v2236_v60, %v892_v57 }
 0x35e   :  { %v939_v28 = vmax.f32 %v893_v62, 0.0 }
 0x35f   :  { %v1056_v58 = vpop.f32.mrf.mxu0 }
 0x360   :  { %v1057_v59 = vadd.f32 %v2268_v23, %v1056_v58 }
 0x362   :  { %v1129_v63 = vmax.f32 %v1057_v59, 0.0 }
 0x363   :  { %v894_v0 = vpop.f32.mrf.mxu3 }
 0x364   :  { %v895_v1 = vadd.f32 %v2236_v60, %v894_v0  ;;  %v1175_v2 = vpack.c.bf16 %v1129_v63, %v1128_v61 }
 0x366   :  { %v940_v3 = vmax.f32 %v895_v1, 0.0  ;;  %1260 = vmatmul.bf16.gmra.mxu1 %v1175_v2 }
 0x367   :  { %v1059_v4 = vpop.f32.mrf.mxu0 }
 0x368   :  { %v977_v5 = vpack.c.bf16 %v940_v3, %v939_v28  ;;  %v1060_v8 = vadd.f32 %v2268_v23, %v1059_v4 }
 0x36a   :  { %1098 = vmatmul.bf16.gmra.mxu0 %v977_v5  ;;  %v1130_v10 = vmax.f32 %v1060_v8, 0.0 }
 0x36b   :  { %v897_v7 = vpop.f32.mrf.mxu3 }
 0x36c   :  { %v898_v12 = vadd.f32 %v2236_v60, %v897_v7 }
 0x36e   :  { %v941_v16 = vmax.f32 %v898_v12, 0.0 }
 0x36f   :  { %v1061_v42 = vpop.f32.mrf.mxu0 }
 0x370   :  { %v1062_v9 = vadd.f32 %v2268_v23, %v1061_v42 }
 0x372   :  { %v1131_v13 = vmax.f32 %v1062_v9, 0.0 }
 0x373   :  { %v899_v19 = vpop.f32.mrf.mxu3 }
 0x374   :  { %v900_v14 = vadd.f32 %v2236_v60, %v899_v19  ;;  %v1176_v15 = vpack.c.bf16 %v1131_v13, %v1130_v10 }
 0x376   :  { %v942_v17 = vmax.f32 %v900_v14, 0.0  ;;  %1265 = vmatmul.bf16.gmra.mxu1 %v1176_v15  ;;  %v2305_v15 = vld [vmem:[%s2396_s3 + $0x5] ss:$0 sm:$0xff] }
 0x377   :  { %v1064_v18 = vpop.f32.mrf.mxu0 }
 0x378   :  { %v978_v56 = vpack.c.bf16 %v942_v17, %v941_v16  ;;  %v1065_v21 = vadd.f32 %v2268_v23, %v1064_v18 }
 0x37a   :  { %1103 = vmatmul.bf16.gmra.mxu0 %v978_v56  ;;  %v1132_v26 = vmax.f32 %v1065_v21, 0.0 }
 0x37b   :  { %v902_v20 = vpop.f32.mrf.mxu3 }
 0x37c   :  { %v903_v27 = vadd.f32 %v2236_v60, %v902_v20 }
 0x37e   :  { %v943_v33 = vmax.f32 %v903_v27, 0.0 }
 0x37f   :  { %v1066_v22 = vpop.f32.mrf.mxu0 }
 0x380   :  { %v1067_v24 = vadd.f32 %v2268_v23, %v1066_v22 }
 0x382   :  { %v1133_v29 = vmax.f32 %v1067_v24, 0.0 }
 0x383   :  { %v904_v30 = vpop.f32.mrf.mxu3 }
 0x384   :  { %v1177_v35 = vpack.c.bf16 %v1133_v29, %v1132_v26  ;;  %v905_v31 = vadd.f32 %v2236_v60, %v904_v30 }
 0x386   :  { %v944_v34 = vmax.f32 %v905_v31, 0.0  ;;  %1270 = vmatmul.bf16.gmra.mxu1 %v1177_v35 }
 0x387   :  { %v1069_v36 = vpop.f32.mrf.mxu0 }
 0x388   :  { %v979_v37 = vpack.c.bf16 %v944_v34, %v943_v33  ;;  %v1070_v39 = vadd.f32 %v2268_v23, %v1069_v36 }
 0x38a   :  { %1108 = vmatmul.bf16.gmra.mxu0 %v979_v37  ;;  %v1134_v43 = vmax.f32 %v1070_v39, 0.0 }
 0x38b   :  { %v907_v38 = vpop.f32.mrf.mxu3 }
 0x38c   :  { %v908_v25 = vadd.f32 %v2236_v60, %v907_v38 }
 0x38e   :  { %v945_v48 = vmax.f32 %v908_v25, 0.0 }
 0x38f   :  { %v1071_v40 = vpop.f32.mrf.mxu0 }
 0x390   :  { %v1072_v41 = vadd.f32 %v2268_v23, %v1071_v40 }
 0x392   :  { %v1135_v44 = vmax.f32 %v1072_v41, 0.0 }
 0x393   :  { %v909_v45 = vpop.f32.mrf.mxu3 }
 0x394   :  { %v1178_v46 = vpack.c.bf16 %v1135_v44, %v1134_v43  ;;  %v910_v47 = vadd.f32 %v2236_v60, %v909_v45 }
 0x396   :  { %v946_v49 = vmax.f32 %v910_v47, 0.0  ;;  %1275 = vmatmul.bf16.gmra.mxu1 %v1178_v46 }
 0x397   :  { %v1074_v50 = vpop.f32.mrf.mxu0 }
 0x398   :  { %v980_v51 = vpack.c.bf16 %v946_v49, %v945_v48  ;;  %v1075_v54 = vadd.f32 %v2268_v23, %v1074_v50 }
 0x39a   :  { %1113 = vmatmul.bf16.gmra.mxu0 %v980_v51  ;;  %v1136_v11 = vmax.f32 %v1075_v54, 0.0 }
 0x39b   :  { %v912_v53 = vpop.f32.mrf.mxu3 }
 0x39c   :  { %v913_v58 = vadd.f32 %v2236_v60, %v912_v53 }
 0x39e   :  { %v947_v0 = vmax.f32 %v913_v58, 0.0 }
 0x39f   :  { %v1076_v55 = vpop.f32.mrf.mxu0 }
 0x3a0   :  { %v1077_v57 = vadd.f32 %v2268_v23, %v1076_v55 }
 0x3a2   :  { %v1137_v59 = vmax.f32 %v1077_v57, 0.0 }
 0x3a3   :  { %v914_v61 = vpop.f32.mrf.mxu3 }
 0x3a4   :  { %v1179_v62 = vpack.c.bf16 %v1137_v59, %v1136_v11  ;;  %v915_v63 = vadd.f32 %v2236_v60, %v914_v61 }
 0x3a6   :  { %v948_v1 = vmax.f32 %v915_v63, 0.0  ;;  %1280 = vmatmul.bf16.gmra.mxu1 %v1179_v62 }
 0x3a7   :  { %v1079_v2 = vpop.f32.mrf.mxu0 }
 0x3a8   :  { %v981_v28 = vpack.c.bf16 %v948_v1, %v947_v0  ;;  %v1080_v3 = vadd.f32 %v2268_v23, %v1079_v2 }
 0x3aa   :  { %1118 = vmatmul.bf16.gmra.mxu0 %v981_v28  ;;  %v1138_v6 = vmax.f32 %v1080_v3, 0.0 }
 0x3af   :  { %v1081_v4 = vpop.f32.mrf.mxu0 }
 0x3b0   :  { %v1082_v5 = vadd.f32 %v2268_v23, %v1081_v4 }
 0x3b2   :  { %v1139_v7 = vmax.f32 %v1082_v5, 0.0 }
 0x3b4   :  { %v1180_v8 = vpack.c.bf16 %v1139_v7, %v1138_v6 }
 0x3b6   :  { %1285 = vmatmul.bf16.gmra.mxu1 %v1180_v8 }
 0x3b7   :  { %v1084_v42 = vpop.f32.mrf.mxu0 }
 0x3b8   :  { %v1085_v9 = vadd.f32 %v2268_v23, %v1084_v42 }
 0x3ba   :  { %v1140_v12 = vmax.f32 %v1085_v9, 0.0 }
 0x3bf   :  { %v1086_v10 = vpop.f32.mrf.mxu0 }
 0x3c0   :  { %v1087_v60 = vadd.f32 %v2268_v23, %v1086_v10 }
 0x3c2   :  { %v1141_v13 = vmax.f32 %v1087_v60, 0.0 }
 0x3c3   :  { %v1251_v19 = vpop.f32.mrf.mxu1 }
 0x3c4   :  { %v1181_v14 = vpack.c.bf16 %v1141_v13, %v1140_v12  ;;  %v1252_v17 = vadd.f32 %v2305_v15, %v1251_v19 }
 0x3c6   :  { %1290 = vmatmul.bf16.gmra.mxu1 %v1181_v14  ;;  %v1331_v20 = vmax.f32 %v1252_v17, 0.0 }
 0x3c7   :  { %v1089_v16 = vpop.f32.mrf.mxu0 }
 0x3c8   :  { %v1090_v21 = vadd.f32 %v2268_v23, %v1089_v16 }
 0x3ca   :  { %v1142_v29 = vmax.f32 %v1090_v21, 0.0 }
 0x3cb   :  { %v1253_v18 = vpop.f32.mrf.mxu1 }
 0x3cc   :  { %v1254_v56 = vadd.f32 %v2305_v15, %v1253_v18 }
 0x3ce   :  { %v1332_v22 = vmax.f32 %v1254_v56, 0.0 }
 0x3cf   :  { %v1091_v24 = vpop.f32.mrf.mxu0 }
 0x3d0   :  { %v1380_v26 = vpack.c.bf16 %v1332_v22, %v1331_v20  ;;  %v1092_v27 = vadd.f32 %v2268_v23, %v1091_v24 }
 0x3d2   :  { %v1143_v30 = vmax.f32 %v1092_v27, 0.0  ;;  %1457 = vmatmul.bf16.vlgmr.msrb.gmra.mxu2 %v1380_v26 }
 0x3d3   :  { %v1256_v35 = vpop.f32.mrf.mxu1 }
 0x3d4   :  { %v1182_v31 = vpack.c.bf16 %v1143_v30, %v1142_v29  ;;  %v1257_v33 = vadd.f32 %v2305_v15, %v1256_v35 }
 0x3d6   :  { %1295 = vmatmul.bf16.gmra.mxu1 %v1182_v31  ;;  %v1333_v37 = vmax.f32 %v1257_v33, 0.0 }
 0x3d7   :  { %v1094_v32 = vpop.f32.mrf.mxu0 }
 0x3d8   :  { %v1095_v38 = vadd.f32 %v2268_v23, %v1094_v32 }
 0x3da   :  { %v1144_v25 = vmax.f32 %v1095_v38, 0.0 }
 0x3db   :  { %v1258_v34 = vpop.f32.mrf.mxu1 }
 0x3dc   :  { %v1259_v36 = vadd.f32 %v2305_v15, %v1258_v34 }
 0x3de   :  { %v1334_v39 = vmax.f32 %v1259_v36, 0.0 }
 0x3df   :  { %v1096_v40 = vpop.f32.mrf.mxu0 }
 0x3e0   :  { %v1097_v41 = vadd.f32 %v2268_v23, %v1096_v40  ;;  %v1381_v43 = vpack.c.bf16 %v1334_v39, %v1333_v37 }
 0x3e2   :  { %v1145_v44 = vmax.f32 %v1097_v41, 0.0  ;;  %1462 = vmatmul.bf16.gmra.mxu2 %v1381_v43 }
 0x3e3   :  { %v1261_v45 = vpop.f32.mrf.mxu1 }
 0x3e4   :  { %v1183_v46 = vpack.c.bf16 %v1145_v44, %v1144_v25  ;;  %v1262_v48 = vadd.f32 %v2305_v15, %v1261_v45 }
 0x3e6   :  { %1300 = vmatmul.bf16.gmra.mxu1 %v1183_v46  ;;  %v1335_v51 = vmax.f32 %v1262_v48, 0.0 }
 0x3e7   :  { %v1099_v47 = vpop.f32.mrf.mxu0 }
 0x3e8   :  { %v1100_v52 = vadd.f32 %v2268_v23, %v1099_v47 }
 0x3ea   :  { %v1146_v11 = vmax.f32 %v1100_v52, 0.0 }
 0x3eb   :  { %v1263_v49 = vpop.f32.mrf.mxu1 }
 0x3ec   :  { %v1264_v50 = vadd.f32 %v2305_v15, %v1263_v49 }
 0x3ee   :  { %v1336_v53 = vmax.f32 %v1264_v50, 0.0 }
 0x3ef   :  { %v1101_v54 = vpop.f32.mrf.mxu0 }
 0x3f0   :  { %v1102_v55 = vadd.f32 %v2268_v23, %v1101_v54  ;;  %v1382_v57 = vpack.c.bf16 %v1336_v53, %v1335_v51 }
 0x3f2   :  { %v1147_v58 = vmax.f32 %v1102_v55, 0.0  ;;  %1467 = vmatmul.bf16.gmra.mxu2 %v1382_v57 }
 0x3f3   :  { %v1266_v59 = vpop.f32.mrf.mxu1 }
 0x3f4   :  { %v1184_v61 = vpack.c.bf16 %v1147_v58, %v1146_v11  ;;  %v1267_v63 = vadd.f32 %v2305_v15, %v1266_v59 }
 0x3f6   :  { %1305 = vmatmul.bf16.gmra.mxu1 %v1184_v61  ;;  %v1337_v2 = vmax.f32 %v1267_v63, 0.0 }
 0x3f7   :  { %v1104_v62 = vpop.f32.mrf.mxu0 }
 0x3f8   :  { %v1105_v28 = vadd.f32 %v2268_v23, %v1104_v62 }
 0x3fa   :  { %v1148_v7 = vmax.f32 %v1105_v28, 0.0 }
 0x3fb   :  { %v1268_v0 = vpop.f32.mrf.mxu1 }
 0x3fc   :  { %v1269_v1 = vadd.f32 %v2305_v15, %v1268_v0 }
 0x3fe   :  { %v1338_v3 = vmax.f32 %v1269_v1, 0.0 }
 0x3ff   :  { %v1106_v4 = vpop.f32.mrf.mxu0 }
 0x400   :  { %v1107_v5 = vadd.f32 %v2268_v23, %v1106_v4  ;;  %v1383_v6 = vpack.c.bf16 %v1338_v3, %v1337_v2  ;;  %v2342_v3 = vld [vmem:[%s2396_s3 + $0x6] ss:$0 sm:$0xff]  ;;  %s2021_s3 = smov [#allocation5]  }
 0x401   :  { %s1574_s13 = sshll.u32 %s2021_s3, 4  ;;  %s1575_s13 = int_to_ptr.vmem [resolvable:$true] %s1574_s13 }
 0x402   :  { %v1149_v8 = vmax.f32 %v1107_v5, 0.0  ;;  %1472 = vmatmul.bf16.gmra.mxu2 %v1383_v6 }
 0x403   :  { %v1271_v42 = vpop.f32.mrf.mxu1 }
 0x404   :  { %v1185_v9 = vpack.c.bf16 %v1149_v8, %v1148_v7  ;;  %v1272_v60 = vadd.f32 %v2305_v15, %v1271_v42 }
 0x406   :  { %1310 = vmatmul.bf16.gmra.mxu1 %v1185_v9  ;;  %v1339_v19 = vmax.f32 %v1272_v60, 0.0 }
 0x407   :  { %v1109_v10 = vpop.f32.mrf.mxu0 }
 0x408   :  { %v1110_v14 = vadd.f32 %v2268_v23, %v1109_v10 }
 0x40a   :  { %v1150_v20 = vmax.f32 %v1110_v14, 0.0 }
 0x40b   :  { %v1273_v12 = vpop.f32.mrf.mxu1 }
 0x40c   :  { %v1274_v13 = vadd.f32 %v2305_v15, %v1273_v12 }
 0x40e   :  { %v1340_v16 = vmax.f32 %v1274_v13, 0.0 }
 0x40f   :  { %v1111_v17 = vpop.f32.mrf.mxu0 }
 0x410   :  { %v1384_v18 = vpack.c.bf16 %v1340_v16, %v1339_v19  ;;  %v1112_v56 = vadd.f32 %v2268_v23, %v1111_v17 }
 0x412   :  { %v1151_v21 = vmax.f32 %v1112_v56, 0.0  ;;  %1477 = vmatmul.bf16.gmra.mxu2 %v1384_v18 }
 0x413   :  { %v1276_v22 = vpop.f32.mrf.mxu1 }
 0x414   :  { %v1186_v24 = vpack.c.bf16 %v1151_v21, %v1150_v20  ;;  %v1277_v27 = vadd.f32 %v2305_v15, %v1276_v22 }
 0x416   :  { %1315 = vmatmul.bf16.gmra.mxu1 %v1186_v24  ;;  %v1341_v35 = vmax.f32 %v1277_v27, 0.0 }
 0x417   :  { %v1114_v26 = vpop.f32.mrf.mxu0 }
 0x418   :  { %v1115_v31 = vadd.f32 %v2268_v23, %v1114_v26 }
 0x41a   :  { %v1152_v37 = vmax.f32 %v1115_v31, 0.0 }
 0x41b   :  { %v1278_v29 = vpop.f32.mrf.mxu1 }
 0x41c   :  { %v1279_v30 = vadd.f32 %v2305_v15, %v1278_v29 }
 0x41e   :  { %v1342_v32 = vmax.f32 %v1279_v30, 0.0 }
 0x41f   :  { %v1116_v33 = vpop.f32.mrf.mxu0 }
 0x420   :  { %v1385_v34 = vpack.c.bf16 %v1342_v32, %v1341_v35  ;;  %v1117_v36 = vadd.f32 %v2268_v23, %v1116_v33 }
 0x422   :  { %v1153_v38 = vmax.f32 %v1117_v36, 0.0  ;;  %1482 = vmatmul.bf16.gmra.mxu2 %v1385_v34 }
 0x423   :  { %v1281_v39 = vpop.f32.mrf.mxu1 }
 0x424   :  { %v1187_v40 = vpack.c.bf16 %v1153_v38, %v1152_v37  ;;  %v1282_v43 = vadd.f32 %v2305_v15, %v1281_v39 }
 0x426   :  { %1320 = vmatmul.bf16.gmra.mxu1 %v1187_v40  ;;  %v1343_v45 = vmax.f32 %v1282_v43, 0.0 }
 0x427   :  { %v1119_v41 = vpop.f32.mrf.mxu0 }
 0x428   :  { %v1120_v46 = vadd.f32 %v2268_v23, %v1119_v41 }
 0x42a   :  { %v1154_v51 = vmax.f32 %v1120_v46, 0.0 }
 0x42b   :  { %v1283_v25 = vpop.f32.mrf.mxu1 }
 0x42c   :  { %v1284_v44 = vadd.f32 %v2305_v15, %v1283_v25 }
 0x42e   :  { %v1344_v47 = vmax.f32 %v1284_v44, 0.0 }
 0x42f   :  { %v1121_v48 = vpop.f32.mrf.mxu0 }
 0x430   :  { %v1386_v49 = vpack.c.bf16 %v1344_v47, %v1343_v45  ;;  %v1122_v50 = vadd.f32 %v2268_v23, %v1121_v48 }
 0x432   :  { %v1155_v52 = vmax.f32 %v1122_v50, 0.0  ;;  %1487 = vmatmul.bf16.gmra.mxu2 %v1386_v49 }
 0x433   :  { %v1286_v53 = vpop.f32.mrf.mxu1 }
 0x434   :  { %v1188_v54 = vpack.c.bf16 %v1155_v52, %v1154_v51  ;;  %v1287_v55 = vadd.f32 %v2305_v15, %v1286_v53 }
 0x436   :  { %1325 = vmatmul.bf16.gmra.mxu1 %v1188_v54  ;;  %v1345_v58 = vmax.f32 %v1287_v55, 0.0 }
 0x43b   :  { %v1288_v57 = vpop.f32.mrf.mxu1 }
 0x43c   :  { %v1289_v11 = vadd.f32 %v2305_v15, %v1288_v57 }
 0x43e   :  { %v1346_v59 = vmax.f32 %v1289_v11, 0.0 }
 0x440   :  { %v1387_v61 = vpack.c.bf16 %v1346_v59, %v1345_v58 }
 0x442   :  { %1492 = vmatmul.bf16.gmra.mxu2 %v1387_v61 }
 0x443   :  { %v1291_v62 = vpop.f32.mrf.mxu1 }
 0x444   :  { %v1292_v63 = vadd.f32 %v2305_v15, %v1291_v62 }
 0x446   :  { %v1347_v1 = vmax.f32 %v1292_v63, 0.0 }
 0x44b   :  { %v1293_v0 = vpop.f32.mrf.mxu1 }
 0x44c   :  { %v1294_v23 = vadd.f32 %v2305_v15, %v1293_v0 }
 0x44e   :  { %v1348_v2 = vmax.f32 %v1294_v23, 0.0 }
 0x450   :  { %v1388_v28 = vpack.c.bf16 %v1348_v2, %v1347_v1 }
 0x452   :  { %1497 = vmatmul.bf16.gmra.mxu2 %v1388_v28 }
 0x453   :  { %v1296_v4 = vpop.f32.mrf.mxu1 }
 0x454   :  { %v1297_v7 = vadd.f32 %v2305_v15, %v1296_v4 }
 0x455   :  { %v1458_v5 = vpop.f32.mrf.mxu2 }
 0x456   :  { %v1459_v6 = vadd.f32 %v2342_v3, %v1458_v5  ;;  %v1349_v10 = vmax.f32 %v1297_v7, 0.0 }
 0x458   :  { %1538 = vst [vmem:[#allocation5] sm:$0xff] %v1459_v6 }
 0x45b   :  { %v1298_v8 = vpop.f32.mrf.mxu1 }
 0x45c   :  { %v1299_v42 = vadd.f32 %v2305_v15, %v1298_v8 }
 0x45d   :  { %v1460_v9 = vpop.f32.mrf.mxu2 }
 0x45e   :  { %v1350_v60 = vmax.f32 %v1299_v42, 0.0  ;;  %v1461_v12 = vadd.f32 %v2342_v3, %v1460_v9 }
 0x460   :  { %v1389_v13 = vpack.c.bf16 %v1350_v60, %v1349_v10  ;;  %1539 = vst [vmem:[#allocation5 + $0x8] sm:$0xff] %v1461_v12 }
 0x462   :  { %1502 = vmatmul.bf16.gmra.mxu2 %v1389_v13 }
 0x463   :  { %v1301_v19 = vpop.f32.mrf.mxu1 }
 0x464   :  { %v1302_v17 = vadd.f32 %v2305_v15, %v1301_v19 }
 0x465   :  { %v1463_v14 = vpop.f32.mrf.mxu2 }
 0x466   :  { %v1464_v16 = vadd.f32 %v2342_v3, %v1463_v14  ;;  %v1351_v21 = vmax.f32 %v1302_v17, 0.0 }
 0x468   :  { %1540 = vst [vmem:[#allocation5 + $0x10] sm:$0xff] %v1464_v16 }
 0x46b   :  { %v1303_v18 = vpop.f32.mrf.mxu1 }
 0x46c   :  { %v1304_v56 = vadd.f32 %v2305_v15, %v1303_v18 }
 0x46d   :  { %v1465_v20 = vpop.f32.mrf.mxu2 }
 0x46e   :  { %v1352_v22 = vmax.f32 %v1304_v56, 0.0  ;;  %v1466_v24 = vadd.f32 %v2342_v3, %v1465_v20 }
 0x470   :  { %v1390_v26 = vpack.c.bf16 %v1352_v22, %v1351_v21  ;;  %1541 = vst [vmem:[#allocation5 + $0x18] sm:$0xff] %v1466_v24 }
 0x472   :  { %1507 = vmatmul.bf16.gmra.mxu2 %v1390_v26 }
 0x473   :  { %v1306_v27 = vpop.f32.mrf.mxu1 }
 0x474   :  { %v1307_v35 = vadd.f32 %v2305_v15, %v1306_v27 }
 0x475   :  { %v1468_v29 = vpop.f32.mrf.mxu2 }
 0x476   :  { %v1469_v30 = vadd.f32 %v2342_v3, %v1468_v29  ;;  %v1353_v34 = vmax.f32 %v1307_v35, 0.0 }
 0x478   :  { %1542 = vst [vmem:[#allocation5 + $0x20] sm:$0xff] %v1469_v30 }
 0x47b   :  { %v1308_v31 = vpop.f32.mrf.mxu1 }
 0x47c   :  { %v1309_v32 = vadd.f32 %v2305_v15, %v1308_v31 }
 0x47d   :  { %v1470_v33 = vpop.f32.mrf.mxu2 }
 0x47e   :  { %v1354_v36 = vmax.f32 %v1309_v32, 0.0  ;;  %v1471_v37 = vadd.f32 %v2342_v3, %v1470_v33 }
 0x480   :  { %v1391_v38 = vpack.c.bf16 %v1354_v36, %v1353_v34  ;;  %1543 = vst [vmem:[#allocation5 + $0x28] sm:$0xff] %v1471_v37 }
 0x482   :  { %1512 = vmatmul.bf16.gmra.mxu2 %v1391_v38 }
 0x483   :  { %v1311_v39 = vpop.f32.mrf.mxu1 }
 0x484   :  { %v1312_v43 = vadd.f32 %v2305_v15, %v1311_v39 }
 0x485   :  { %v1473_v40 = vpop.f32.mrf.mxu2 }
 0x486   :  { %v1474_v41 = vadd.f32 %v2342_v3, %v1473_v40  ;;  %v1355_v46 = vmax.f32 %v1312_v43, 0.0 }
 0x488   :  { %1544 = vst [vmem:[#allocation5 + $0x30] sm:$0xff] %v1474_v41 }
 0x48b   :  { %v1313_v25 = vpop.f32.mrf.mxu1 }
 0x48c   :  { %v1314_v44 = vadd.f32 %v2305_v15, %v1313_v25 }
 0x48d   :  { %v1475_v45 = vpop.f32.mrf.mxu2 }
 0x48e   :  { %v1356_v47 = vmax.f32 %v1314_v44, 0.0  ;;  %v1476_v48 = vadd.f32 %v2342_v3, %v1475_v45 }
 0x490   :  { %v1392_v49 = vpack.c.bf16 %v1356_v47, %v1355_v46  ;;  %1545 = vst [vmem:[#allocation5 + $0x38] sm:$0xff] %v1476_v48 }
 0x492   :  { %1517 = vmatmul.bf16.gmra.mxu2 %v1392_v49 }
 0x493   :  { %v1316_v50 = vpop.f32.mrf.mxu1 }
 0x494   :  { %v1317_v53 = vadd.f32 %v2305_v15, %v1316_v50 }
 0x495   :  { %v1478_v51 = vpop.f32.mrf.mxu2 }
 0x496   :  { %v1479_v52 = vadd.f32 %v2342_v3, %v1478_v51  ;;  %v1357_v11 = vmax.f32 %v1317_v53, 0.0 }
 0x498   :  { %1546 = vst [vmem:[#allocation5 + $0x40] sm:$0xff] %v1479_v52 }
 0x49b   :  { %v1318_v54 = vpop.f32.mrf.mxu1 }
 0x49c   :  { %v1319_v55 = vadd.f32 %v2305_v15, %v1318_v54 }
 0x49d   :  { %v1480_v57 = vpop.f32.mrf.mxu2 }
 0x49e   :  { %v1358_v58 = vmax.f32 %v1319_v55, 0.0  ;;  %v1481_v59 = vadd.f32 %v2342_v3, %v1480_v57 }
 0x4a0   :  { %v1393_v61 = vpack.c.bf16 %v1358_v58, %v1357_v11  ;;  %1547 = vst [vmem:[#allocation5 + $0x48] sm:$0xff] %v1481_v59 }
 0x4a2   :  { %1522 = vmatmul.bf16.gmra.mxu2 %v1393_v61 }
 0x4a3   :  { %v1321_v62 = vpop.f32.mrf.mxu1 }
 0x4a4   :  { %v1322_v23 = vadd.f32 %v2305_v15, %v1321_v62 }
 0x4a5   :  { %v1483_v63 = vpop.f32.mrf.mxu2 }
 0x4a6   :  { %v1484_v0 = vadd.f32 %v2342_v3, %v1483_v63  ;;  %v1359_v4 = vmax.f32 %v1322_v23, 0.0 }
 0x4a8   :  { %1548 = vst [vmem:[#allocation5 + $0x50] sm:$0xff] %v1484_v0 }
 0x4ab   :  { %v1323_v1 = vpop.f32.mrf.mxu1 }
 0x4ac   :  { %v1324_v2 = vadd.f32 %v2305_v15, %v1323_v1 }
 0x4ad   :  { %v1485_v28 = vpop.f32.mrf.mxu2 }
 0x4ae   :  { %v1360_v5 = vmax.f32 %v1324_v2, 0.0  ;;  %v1486_v6 = vadd.f32 %v2342_v3, %v1485_v28 }
 0x4b0   :  { %v1394_v7 = vpack.c.bf16 %v1360_v5, %v1359_v4  ;;  %1549 = vst [vmem:[#allocation5 + $0x58] sm:$0xff] %v1486_v6 }
 0x4b2   :  { %1527 = vmatmul.bf16.gmra.mxu2 %v1394_v7 }
 0x4b3   :  { %v1326_v8 = vpop.f32.mrf.mxu1 }
 0x4b4   :  { %v1327_v10 = vadd.f32 %v2305_v15, %v1326_v8 }
 0x4b5   :  { %v1488_v42 = vpop.f32.mrf.mxu2 }
 0x4b6   :  { %v1489_v9 = vadd.f32 %v2342_v3, %v1488_v42  ;;  %v1361_v19 = vmax.f32 %v1327_v10, 0.0 }
 0x4b8   :  { %1550 = vst [vmem:[#allocation5 + $0x60] sm:$0xff] %v1489_v9 }
 0x4bb   :  { %v1328_v60 = vpop.f32.mrf.mxu1 }
 0x4bc   :  { %v1329_v12 = vadd.f32 %v2305_v15, %v1328_v60 }
 0x4bd   :  { %v1490_v13 = vpop.f32.mrf.mxu2 }
 0x4be   :  { %v1362_v14 = vmax.f32 %v1329_v12, 0.0  ;;  %v1491_v16 = vadd.f32 %v2342_v3, %v1490_v13 }
 0x4c0   :  { %v1395_v17 = vpack.c.bf16 %v1362_v14, %v1361_v19  ;;  %1551 = vst [vmem:[#allocation5 + $0x68] sm:$0xff] %v1491_v16 }
 0x4c2   :  { %1532 = vmatmul.bf16.gmra.mxu2 %v1395_v17 }
 0x4c5   :  { %v1493_v18 = vpop.f32.mrf.mxu2 }
 0x4c6   :  { %v1494_v56 = vadd.f32 %v2342_v3, %v1493_v18 }
 0x4c8   :  { %1552 = vst [vmem:[#allocation5 + $0x70] sm:$0xff] %v1494_v56 }
 0x4cd   :  { %v1495_v20 = vpop.f32.mrf.mxu2 }
 0x4ce   :  { %v1496_v21 = vadd.f32 %v2342_v3, %v1495_v20 }
 0x4d0   :  { %1553 = vst [vmem:[#allocation5 + $0x78] sm:$0xff] %v1496_v21 }
 0x4d5   :  { %v1498_v22 = vpop.f32.mrf.mxu2 }
 0x4d6   :  { %v1499_v24 = vadd.f32 %v2342_v3, %v1498_v22 }
 0x4d8   :  { %1554 = vst [vmem:[#allocation5 + $0x80] sm:$0xff] %v1499_v24 }
 0x4dd   :  { %v1500_v15 = vpop.f32.mrf.mxu2 }
 0x4de   :  { %v1501_v26 = vadd.f32 %v2342_v3, %v1500_v15 }
 0x4e0   :  { %1555 = vst [vmem:[#allocation5 + $0x88] sm:$0xff] %v1501_v26 }
 0x4e5   :  { %v1503_v27 = vpop.f32.mrf.mxu2 }
 0x4e6   :  { %v1504_v29 = vadd.f32 %v2342_v3, %v1503_v27 }
 0x4e8   :  { %1556 = vst [vmem:[#allocation5 + $0x90] sm:$0xff] %v1504_v29 }
 0x4ed   :  { %v1505_v30 = vpop.f32.mrf.mxu2 }
 0x4ee   :  { %v1506_v35 = vadd.f32 %v2342_v3, %v1505_v30 }
 0x4f0   :  { %1557 = vst [vmem:[#allocation5 + $0x98] sm:$0xff] %v1506_v35 }
 0x4f5   :  { %v1508_v31 = vpop.f32.mrf.mxu2 }
 0x4f6   :  { %v1509_v32 = vadd.f32 %v2342_v3, %v1508_v31 }
 0x4f8   :  { %1558 = vst [vmem:[#allocation5 + $0xa0] sm:$0xff] %v1509_v32 }
 0x4fd   :  { %v1510_v33 = vpop.f32.mrf.mxu2 }
 0x4fe   :  { %v1511_v34 = vadd.f32 %v2342_v3, %v1510_v33 }
 0x500   :  { %1559 = vst [vmem:[#allocation5 + $0xa8] sm:$0xff] %v1511_v34 }
 0x505   :  { %v1513_v36 = vpop.f32.mrf.mxu2 }
 0x506   :  { %v1514_v37 = vadd.f32 %v2342_v3, %v1513_v36 }
 0x508   :  { %1560 = vst [vmem:[#allocation5 + $0xb0] sm:$0xff] %v1514_v37 }
 0x50d   :  { %v1515_v38 = vpop.f32.mrf.mxu2 }
 0x50e   :  { %v1516_v39 = vadd.f32 %v2342_v3, %v1515_v38 }
 0x510   :  { %1561 = vst [vmem:[#allocation5 + $0xb8] sm:$0xff] %v1516_v39 }
 0x515   :  { %v1518_v40 = vpop.f32.mrf.mxu2 }
 0x516   :  { %v1519_v41 = vadd.f32 %v2342_v3, %v1518_v40 }
 0x518   :  { %1562 = vst [vmem:[#allocation5 + $0xc0] sm:$0xff] %v1519_v41 }
 0x51d   :  { %v1520_v43 = vpop.f32.mrf.mxu2 }
 0x51e   :  { %v1521_v25 = vadd.f32 %v2342_v3, %v1520_v43 }
 0x520   :  { %1563 = vst [vmem:[#allocation5 + $0xc8] sm:$0xff] %v1521_v25 }
 0x525   :  { %v1523_v44 = vpop.f32.mrf.mxu2 }
 0x526   :  { %v1524_v45 = vadd.f32 %v2342_v3, %v1523_v44 }
 0x528   :  { %1564 = vst [vmem:[#allocation5 + $0xd0] sm:$0xff] %v1524_v45 }
 0x52d   :  { %v1525_v46 = vpop.f32.mrf.mxu2 }
 0x52e   :  { %v1526_v47 = vadd.f32 %v2342_v3, %v1525_v46 }
 0x530   :  { %1565 = vst [vmem:[#allocation5 + $0xd8] sm:$0xff] %v1526_v47 }
 0x535   :  { %v1528_v48 = vpop.f32.mrf.mxu2 }
 0x536   :  { %v1529_v49 = vadd.f32 %v2342_v3, %v1528_v48 }
 0x538   :  { %1566 = vst [vmem:[#allocation5 + $0xe0] sm:$0xff] %v1529_v49 }
 0x53d   :  { %v1530_v50 = vpop.f32.mrf.mxu2 }
 0x53e   :  { %v1531_v51 = vadd.f32 %v2342_v3, %v1530_v50 }
 0x540   :  { %1567 = vst [vmem:[#allocation5 + $0xe8] sm:$0xff] %v1531_v51 }
 0x545   :  { %v1533_v52 = vpop.f32.mrf.mxu2 }
 0x546   :  { %v1534_v53 = vadd.f32 %v2342_v3, %v1533_v52 }
 0x548   :  { %1568 = vst [vmem:[#allocation5 + $0xf0] sm:$0xff] %v1534_v53 }
 0x54d   :  { %v1535_v54 = vpop.f32.mrf.mxu2 }
 0x54e   :  { %v1536_v55 = vadd.f32 %v2342_v3, %v1535_v54 }
 0x550   :  { %1569 = vst [vmem:[#allocation5 + $0xf8] sm:$0xff] %v1536_v55 }
 0x551   :  { %1582 = dma.vmem_to_hbm [thread:$0]  %s1575_s13, 4096, %s1577_s16, [#allocation4], %s2022_s17, %s2022_s17, %s2023_s18  }
 0x552   :  { %2016 = dma.done.wait [#allocation4], 4096  }
 0x553   :  { %2017 = vsyncadd [#allocation4], 4294963200 }
 0x554   :  { %1587 = vsyncpa [#allocation3], 1 }
 0x555   :  { %1588 = vsyncpa [#allocation4], 1 }

</bundles_post_ra>
